<compile_context>
chip_gen: v7x
topology: tpu7x:2x2x1
jax: 0.10.0
libtpu: 0.0.40
codegen_flags: <defaults>
</compile_context>

<pallas_src>
import math

import jax
import jax.numpy as jnp
from jax.experimental import pallas as pl
from jax.experimental.pallas import tpu as pltpu


def _make_fc1_kernel(num_passive: int):
    """Builds the fused FC1 forward kernel for `num_passive` passive parties.

    Ref layout (all whole-array VMEM blocks):
      inputs : x_0..x_{P-1}     (B, K_i)   flattened party inputs
               w_0..w_{P-1}     (K_i, N_i) passive Linear weights (in, out)
               b_0..b_{P-1}     (1, N_i)   passive Linear biases
               s_0..s_{P-1}     (1, N_i)   folded BN scale  = gamma / sqrt(var+eps)
               t_0..t_{P-1}     (1, N_i)   folded BN shift  = beta - mean*scale
               wa_0..wa_{P-1}   (N_i, C)   active-weight split for party i
               ba               (1, C)     active bias
      outputs: emb_0..emb_{P-1} (B, N_i)
               logit            (B, C)
               pred             (B, C)
    """
    P = num_passive

    def kernel(*refs):
        x_refs = refs[0:P]
        w_refs = refs[P:2 * P]
        b_refs = refs[2 * P:3 * P]
        s_refs = refs[3 * P:4 * P]
        t_refs = refs[4 * P:5 * P]
        wa_refs = refs[5 * P:6 * P]
        ba_ref = refs[6 * P]
        emb_refs = refs[6 * P + 1:7 * P + 1]
        logit_ref = refs[7 * P + 1]
        pred_ref = refs[7 * P + 2]

        logits = None
        for i in range(P):
            # Passive party i: Linear -> BatchNorm(eval, folded affine) -> ReLU.
            h = jnp.dot(x_refs[i][...], w_refs[i][...],
                        preferred_element_type=jnp.float32)
            h = h + b_refs[i][...]
            h = h * s_refs[i][...] + t_refs[i][...]
            emb = jnp.maximum(h, 0.0)
            emb_refs[i][...] = emb.astype(emb_refs[i].dtype)

            # Active-head contribution.  Concat aggregation is folded into the
            # matmul (active weight split along K); padding-mode sum
            # aggregation reuses the same weight for every party.
            # Dropout(p=0.5) is identity in eval mode.
            part = jnp.dot(emb, wa_refs[i][...],
                           preferred_element_type=jnp.float32)
            logits = part if logits is None else logits + part

        logits = logits + ba_ref[...]
        logit_ref[...] = logits.astype(logit_ref.dtype)

        # Softmax(dim=1), numerically stable.
        m = jnp.max(logits, axis=-1, keepdims=True)
        e = jnp.exp(logits - m)
        pred_ref[...] = (e / jnp.sum(e, axis=-1, keepdims=True)).astype(
            pred_ref.dtype)

    return kernel


def fc1_forward(xs, passive_params, active_params, *, padding_mode=False,
                eps: float = 1e-5):
    """Fused forward pass of FC1, returning (emb_list, logit, pred).

    xs             : list of P party inputs, each (B, ...); flattened row-major
                     (== torch `.view(B, -1)`) as a metadata-only reshape.
    passive_params : list of P tuples (w, b, gamma, beta, running_mean,
                     running_var); w in PyTorch layout (out_features, in_features).
    active_params  : (w_act, b_act) with w_act: (num_classes, agg_features).
    """
    P = len(xs)
    B = xs[0].shape[0]

    x_flats, w_ts, biases, scales, shifts, emb_sizes = [], [], [], [], [], []
    for i in range(P):
        x = xs[i]
        K = math.prod(x.shape[1:])
        # Flatten_input: metadata-only reshape — no copy kernel (perf fix #1).
        x_flats.append(x.reshape(B, K))

        w, b, gamma, beta, mean, var = passive_params[i]
        N = w.shape[0]
        emb_sizes.append(N)
        # One-time layout change to (in, out); tiny XLA-side op, done once.
        w_ts.append(w.T)
        # Fold eval-mode BatchNorm into a per-feature affine.
        scale = gamma / jnp.sqrt(var + eps)
        shift = beta - mean * scale
        biases.append(b.reshape(1, N))
        scales.append(scale.reshape(1, N))
        shifts.append(shift.reshape(1, N))

    w_act, b_act = active_params
    num_classes = w_act.shape[0]
    w_act_t = w_act.T  # (agg_features, num_classes)

    if padding_mode:
        # Sum aggregation: (sum_i emb_i) @ W == sum_i (emb_i @ W).
        wact_parts = [w_act_t] * P
    else:
        # Concat aggregation folded into the matmul: split W along K.
        offs = [0]
        for n in emb_sizes:
            offs.append(offs[-1] + n)
        assert offs[-1] == w_act_t.shape[0], "active weight / emb size mismatch"
        wact_parts = [w_act_t[offs[i]:offs[i + 1], :] for i in range(P)]

    inputs = (*x_flats, *w_ts, *biases, *scales, *shifts, *wact_parts,
              b_act.reshape(1, num_classes))

    out_shape = tuple(
        jax.ShapeDtypeStruct((B, n), jnp.float32) for n in emb_sizes
    ) + (
        jax.ShapeDtypeStruct((B, num_classes), jnp.float32),
        jax.ShapeDtypeStruct((B, num_classes), jnp.float32),
    )

    # All operands fit comfortably in VMEM at FC1's real sizes (28x28 MNIST:
    # ~1.3 MiB of weights, <1 MiB of activations for batch <= 512), so a single
    # whole-array block per operand maximizes DMA burst size and avoids
    # per-grid-step overhead.  For much larger batches one would add a batch
    # grid axis with dimension_semantics=("parallel",) to shard across cores.
    vmem = pl.BlockSpec(memory_space=pltpu.MemorySpace.VMEM)

    outs = pl.pallas_call(
        _make_fc1_kernel(P),
        out_shape=out_shape,
        in_specs=[vmem] * len(inputs),
        out_specs=tuple([vmem] * len(out_shape)),
    )(*inputs)

    embs = list(outs[:P])
    logit = outs[P]
    pred = outs[P + 1]
    return embs, logit, pred


def _fc1_reference(xs, passive_params, active_params, *, padding_mode=False,
                   eps: float = 1e-5):
    """Plain-JAX eval-mode reference (high-precision matmuls)."""
    hp = jax.lax.Precision.HIGHEST
    embs = []
    for i, x in enumerate(xs):
        B = x.shape[0]
        xf = x.reshape(B, -1)
        w, b, gamma, beta, mean, var = passive_params[i]
        h = jnp.dot(xf, w.T, precision=hp) + b
        h = (h - mean) / jnp.sqrt(var + eps) * gamma + beta
        embs.append(jnp.maximum(h, 0.0))
    if padding_mode:
        agg = sum(embs)
    else:
        agg = jnp.concatenate(embs, axis=1)
    w_act, b_act = active_params
    logit = jnp.dot(agg, w_act.T, precision=hp) + b_act
    pred = jax.nn.softmax(logit, axis=1)
    return embs, logit, pred


if __name__ == "__main__":
    key = jax.random.PRNGKey(0)

    # FC1(num_passive=2, padding_mode=False, division_mode='vertical') on
    # MNIST-shaped data: each passive party holds half of the 28x28 image.
    num_passive = 2
    B = 2
    H = W = 28
    rows = H // num_passive                  # 14 rows per party
    linear_size = rows * W                   # 392
    emb_size = int(W * (H / num_passive))    # 392
    num_classes = 10

    keys = iter(jax.random.split(key, 7 * num_passive + 2))
    xs, passive_params = [], []
    for _ in range(num_passive):
        xs.append(jax.random.normal(next(keys), (B, 1, rows, W), jnp.float32))
        w = 0.05 * jax.random.normal(next(keys), (emb_size, linear_size),
                                     jnp.float32)
        b = 0.05 * jax.random.normal(next(keys), (emb_size,), jnp.float32)
        gamma = 1.0 + 0.1 * jax.random.normal(next(keys), (emb_size,),
                                              jnp.float32)
        beta = 0.1 * jax.random.normal(next(keys), (emb_size,), jnp.float32)
        mean = 0.1 * jax.random.normal(next(keys), (emb_size,), jnp.float32)
        var = 0.5 + jnp.abs(jax.random.normal(next(keys), (emb_size,),
                                              jnp.float32))
        passive_params.append((w, b, gamma, beta, mean, var))
    w_act = 0.05 * jax.random.normal(
        next(keys), (num_classes, num_passive * emb_size), jnp.float32)
    b_act = 0.05 * jax.random.normal(next(keys), (num_classes,), jnp.float32)
    active_params = (w_act, b_act)

    embs, logit, pred = fc1_forward(xs, passive_params, active_params,
                                    padding_mode=False)
    embs, logit, pred = jax.block_until_ready((embs, logit, pred))

    embs_ref, logit_ref, pred_ref = _fc1_reference(
        xs, passive_params, active_params, padding_mode=False)

    assert logit.shape == (B, num_classes) and pred.shape == (B, num_classes)
    # Tolerance covers MXU vs XLA-default f32 matmul precision differences.
    tol = dict(atol=2e-2, rtol=2e-2)
    for e, er in zip(embs, embs_ref):
        assert e.shape == er.shape
        assert jnp.allclose(e, er, **tol), "embedding mismatch vs reference"
    assert jnp.allclose(logit, logit_ref, **tol), "logit mismatch vs reference"
    assert jnp.allclose(pred, pred_ref, **tol), "pred mismatch vs reference"
    assert jnp.allclose(jnp.sum(pred, axis=1), 1.0, atol=1e-4), \
        "softmax rows must sum to 1"

    print("KERNEL_OK")
</pallas_src>

<mosaic_0001>
module attributes {stable_mosaic.version = 11 : i64} {
  func.func @kernel(%arg0: memref<2x392xf32, #tpu.memory_space<vmem>>, %arg1: memref<2x392xf32, #tpu.memory_space<vmem>>, %arg2: memref<392x392xf32, #tpu.memory_space<vmem>>, %arg3: memref<392x392xf32, #tpu.memory_space<vmem>>, %arg4: memref<1x392xf32, #tpu.memory_space<vmem>>, %arg5: memref<1x392xf32, #tpu.memory_space<vmem>>, %arg6: memref<1x392xf32, #tpu.memory_space<vmem>>, %arg7: memref<1x392xf32, #tpu.memory_space<vmem>>, %arg8: memref<1x392xf32, #tpu.memory_space<vmem>>, %arg9: memref<1x392xf32, #tpu.memory_space<vmem>>, %arg10: memref<392x10xf32, #tpu.memory_space<vmem>>, %arg11: memref<392x10xf32, #tpu.memory_space<vmem>>, %arg12: memref<1x10xf32, #tpu.memory_space<vmem>>, %arg13: memref<2x392xf32, #tpu.memory_space<vmem>>, %arg14: memref<2x392xf32, #tpu.memory_space<vmem>>, %arg15: memref<2x10xf32, #tpu.memory_space<vmem>>, %arg16: memref<2x10xf32, #tpu.memory_space<vmem>>) attributes {dimension_semantics = [], scalar_prefetch = 0 : i64, scratch_operands = 0 : i64, tpu.core_type = #tpu.core_type<tc>} {
    %c0 = arith.constant 0 : index
    %c0_0 = arith.constant 0 : index
    %0 = vector.load %arg0[%c0, %c0_0] : memref<2x392xf32, #tpu.memory_space<vmem>>, vector<2x392xf32>
    %c0_1 = arith.constant 0 : index
    %c0_2 = arith.constant 0 : index
    %1 = vector.load %arg2[%c0_1, %c0_2] : memref<392x392xf32, #tpu.memory_space<vmem>>, vector<392x392xf32>
    %cst = arith.constant dense<0.000000e+00> : vector<2x392xf32>
    %2 = tpu.matmul %0, %1, %cst {dimension_numbers = #tpu.dot_dimension_numbers<[1], [0], [0], [1], [0, 0, 1, 1], [], []>} : vector<2x392xf32>, vector<392x392xf32>, vector<2x392xf32> -> vector<2x392xf32>
    %c0_3 = arith.constant 0 : index
    %c0_4 = arith.constant 0 : index
    %3 = vector.load %arg4[%c0_3, %c0_4] : memref<1x392xf32, #tpu.memory_space<vmem>>, vector<1x392xf32>
    %4 = vector.broadcast %3 : vector<1x392xf32> to vector<2x392xf32>
    %5 = arith.addf %2, %4 : vector<2x392xf32>
    %c0_5 = arith.constant 0 : index
    %c0_6 = arith.constant 0 : index
    %6 = vector.load %arg6[%c0_5, %c0_6] : memref<1x392xf32, #tpu.memory_space<vmem>>, vector<1x392xf32>
    %7 = vector.broadcast %6 : vector<1x392xf32> to vector<2x392xf32>
    %8 = arith.mulf %5, %7 : vector<2x392xf32>
    %c0_7 = arith.constant 0 : index
    %c0_8 = arith.constant 0 : index
    %9 = vector.load %arg8[%c0_7, %c0_8] : memref<1x392xf32, #tpu.memory_space<vmem>>, vector<1x392xf32>
    %10 = vector.broadcast %9 : vector<1x392xf32> to vector<2x392xf32>
    %11 = arith.addf %8, %10 : vector<2x392xf32>
    %cst_9 = arith.constant 0.000000e+00 : f32
    %12 = vector.broadcast %cst_9 : f32 to vector<2x392xf32>
    %13 = arith.maximumf %11, %12 : vector<2x392xf32>
    %c0_10 = arith.constant 0 : index
    %c0_11 = arith.constant 0 : index
    %14 = vector.load %arg13[%c0_10, %c0_11] : memref<2x392xf32, #tpu.memory_space<vmem>>, vector<2x392xf32>
    tpu.vector_store %arg13[%c0_10, %c0_11], %13 {strides = array<i32>} : memref<2x392xf32, #tpu.memory_space<vmem>>, vector<2x392xf32>,
    %c0_12 = arith.constant 0 : index
    %c0_13 = arith.constant 0 : index
    %15 = vector.load %arg10[%c0_12, %c0_13] : memref<392x10xf32, #tpu.memory_space<vmem>>, vector<392x10xf32>
    %cst_14 = arith.constant dense<0.000000e+00> : vector<2x10xf32>
    %16 = tpu.matmul %13, %15, %cst_14 {dimension_numbers = #tpu.dot_dimension_numbers<[1], [0], [0], [1], [0, 0, 1, 1], [], []>} : vector<2x392xf32>, vector<392x10xf32>, vector<2x10xf32> -> vector<2x10xf32>
    %c0_15 = arith.constant 0 : index
    %c0_16 = arith.constant 0 : index
    %17 = vector.load %arg1[%c0_15, %c0_16] : memref<2x392xf32, #tpu.memory_space<vmem>>, vector<2x392xf32>
    %c0_17 = arith.constant 0 : index
    %c0_18 = arith.constant 0 : index
    %18 = vector.load %arg3[%c0_17, %c0_18] : memref<392x392xf32, #tpu.memory_space<vmem>>, vector<392x392xf32>
    %cst_19 = arith.constant dense<0.000000e+00> : vector<2x392xf32>
    %19 = tpu.matmul %17, %18, %cst_19 {dimension_numbers = #tpu.dot_dimension_numbers<[1], [0], [0], [1], [0, 0, 1, 1], [], []>} : vector<2x392xf32>, vector<392x392xf32>, vector<2x392xf32> -> vector<2x392xf32>
    %c0_20 = arith.constant 0 : index
    %c0_21 = arith.constant 0 : index
    %20 = vector.load %arg5[%c0_20, %c0_21] : memref<1x392xf32, #tpu.memory_space<vmem>>, vector<1x392xf32>
    %21 = vector.broadcast %20 : vector<1x392xf32> to vector<2x392xf32>
    %22 = arith.addf %19, %21 : vector<2x392xf32>
    %c0_22 = arith.constant 0 : index
    %c0_23 = arith.constant 0 : index
    %23 = vector.load %arg7[%c0_22, %c0_23] : memref<1x392xf32, #tpu.memory_space<vmem>>, vector<1x392xf32>
    %24 = vector.broadcast %23 : vector<1x392xf32> to vector<2x392xf32>
    %25 = arith.mulf %22, %24 : vector<2x392xf32>
    %c0_24 = arith.constant 0 : index
    %c0_25 = arith.constant 0 : index
    %26 = vector.load %arg9[%c0_24, %c0_25] : memref<1x392xf32, #tpu.memory_space<vmem>>, vector<1x392xf32>
    %27 = vector.broadcast %26 : vector<1x392xf32> to vector<2x392xf32>
    %28 = arith.addf %25, %27 : vector<2x392xf32>
    %cst_26 = arith.constant 0.000000e+00 : f32
    %29 = vector.broadcast %cst_26 : f32 to vector<2x392xf32>
    %30 = arith.maximumf %28, %29 : vector<2x392xf32>
    %c0_27 = arith.constant 0 : index
    %c0_28 = arith.constant 0 : index
    %31 = vector.load %arg14[%c0_27, %c0_28] : memref<2x392xf32, #tpu.memory_space<vmem>>, vector<2x392xf32>
    tpu.vector_store %arg14[%c0_27, %c0_28], %30 {strides = array<i32>} : memref<2x392xf32, #tpu.memory_space<vmem>>, vector<2x392xf32>,
    %c0_29 = arith.constant 0 : index
    %c0_30 = arith.constant 0 : index
    %32 = vector.load %arg11[%c0_29, %c0_30] : memref<392x10xf32, #tpu.memory_space<vmem>>, vector<392x10xf32>
    %cst_31 = arith.constant dense<0.000000e+00> : vector<2x10xf32>
    %33 = tpu.matmul %30, %32, %cst_31 {dimension_numbers = #tpu.dot_dimension_numbers<[1], [0], [0], [1], [0, 0, 1, 1], [], []>} : vector<2x392xf32>, vector<392x10xf32>, vector<2x10xf32> -> vector<2x10xf32>
    %34 = arith.addf %16, %33 : vector<2x10xf32>
    %c0_32 = arith.constant 0 : index
    %c0_33 = arith.constant 0 : index
    %35 = vector.load %arg12[%c0_32, %c0_33] : memref<1x10xf32, #tpu.memory_space<vmem>>, vector<1x10xf32>
    %36 = vector.broadcast %35 : vector<1x10xf32> to vector<2x10xf32>
    %37 = arith.addf %34, %36 : vector<2x10xf32>
    %c0_34 = arith.constant 0 : index
    %c0_35 = arith.constant 0 : index
    %38 = vector.load %arg15[%c0_34, %c0_35] : memref<2x10xf32, #tpu.memory_space<vmem>>, vector<2x10xf32>
    tpu.vector_store %arg15[%c0_34, %c0_35], %37 {strides = array<i32>} : memref<2x10xf32, #tpu.memory_space<vmem>>, vector<2x10xf32>,
    %cst_36 = arith.constant dense<0xFF800000> : vector<2xf32>
    %39 = vector.multi_reduction <maximumf>, %37, %cst_36 [1] : vector<2x10xf32> to vector<2xf32>
    %40 = vector.shape_cast %39 : vector<2xf32> to vector<2x1xf32>
    %41 = vector.broadcast %40 : vector<2x1xf32> to vector<2x10xf32>
    %42 = arith.subf %37, %41 : vector<2x10xf32>
    %43 = math.exp %42 : vector<2x10xf32>
    %cst_37 = arith.constant dense<0.000000e+00> : vector<2xf32>
    %44 = vector.multi_reduction <add>, %43, %cst_37 [1] : vector<2x10xf32> to vector<2xf32>
    %45 = vector.shape_cast %44 : vector<2xf32> to vector<2x1xf32>
    %46 = vector.broadcast %45 : vector<2x1xf32> to vector<2x10xf32>
    %47 = arith.divf %43, %46 : vector<2x10xf32>
    %c0_38 = arith.constant 0 : index
    %c0_39 = arith.constant 0 : index
    %48 = vector.load %arg16[%c0_38, %c0_39] : memref<2x10xf32, #tpu.memory_space<vmem>>, vector<2x10xf32>
    tpu.vector_store %arg16[%c0_38, %c0_39], %47 {strides = array<i32>} : memref<2x10xf32, #tpu.memory_space<vmem>>, vector<2x10xf32>,
    return
  }
}

</mosaic_0001>

<bundles_post_ra>
// kernel: tpu_custom_call.1
= control target key start
LH: loop header
LB: loop body
LE: loop exit
PB: predicated region body
PF: predicated region fallthrough
CT: control target
= control target key end

     0   :  { %s3142_s0 = inlined_call_operand.vmem [shape: f32[2,392], index: 0, kind: input, shape index: {}]   ;;  %s3143_s1 = inlined_call_operand.vmem [shape: f32[2,392], index: 1, kind: input, shape index: {}]   ;;  %s3144_s2 = inlined_call_operand.hbm [shape: f32[392,392], index: 2, kind: input, shape index: {}]   ;;  %s3145_s3 = inlined_call_operand.hbm [shape: f32[392,392], index: 3, kind: input, shape index: {}]   ;;  %s3146_s4 = inlined_call_operand.vmem [shape: f32[1,392], index: 4, kind: input, shape index: {}]   ;;  %s3147_s5 = inlined_call_operand.vmem [shape: f32[1,392], index: 5, kind: input, shape index: {}]   ;;  %s3148_s6 = inlined_call_operand.vmem [shape: f32[1,392], index: 6, kind: input, shape index: {}]   ;;  %s3149_s7 = inlined_call_operand.vmem [shape: f32[1,392], index: 7, kind: input, shape index: {}]   ;;  %s3150_s8 = inlined_call_operand.vmem [shape: f32[1,392], index: 8, kind: input, shape index: {}]   ;;  %s3151_s9 = inlined_call_operand.vmem [shape: f32[1,392], index: 9, kind: input, shape index: {}]   ;;  %s3152_s10 = inlined_call_operand.vmem [shape: f32[392,10], index: 10, kind: input, shape index: {}]   ;;  %s3153_s11 = inlined_call_operand.vmem [shape: f32[392,10], index: 11, kind: input, shape index: {}]   ;;  %s3154_s12 = inlined_call_operand.vmem [shape: f32[1,10], index: 12, kind: input, shape index: {}]   ;;  %s3155_s13 = inlined_call_operand.hbm [shape: f32[2,392], index: 13, kind: output, shape index: {0}]   ;;  %s3156_s14 = inlined_call_operand.hbm [shape: f32[2,392], index: 14, kind: output, shape index: {1}]   ;;  %s3157_s15 = inlined_call_operand.hbm [shape: f32[2,10], index: 15, kind: output, shape index: {2}]   ;;  %s3158_s16 = inlined_call_operand.hbm [shape: f32[2,10], index: 16, kind: output, shape index: {3}]  }
   0x1   :  { %3159 = sst [smem:[#allocation18_spill]] %s3142_s0 }
   0x2   :  { %22 = vsyncpa [#allocation3], 0 }
   0x3   :  { %23 = vsyncpa [#allocation6], 0 }
   0x4   :  { %24 = vsyncpa [#allocation4], 0 }
   0x5   :  { %25 = vsyncpa [#allocation9], 0 }
   0x6   :  { %26 = vsyncpa [#allocation12], 0  ;;  %s2506_s21 = smov [#allocation2]   ;;  %s2364_s25 = scalar_lea.hbm %s3144_s2, 25088 }
   0x7   :  { %s36_s22 = sshll.u32 %s2506_s21, 4  ;;  %p2365_p0 = scmp.ne.s32.totalorder %s3144_s2, %s2364_s25  ;;  %s37_s22 = int_to_ptr.vmem [resolvable:$true] %s36_s22 }
   0x8   :  { %p2368_p1 = scmp.lt.u32.totalorder %s2364_s25, %s3144_s2 }
   0xa   :  { %p2370_p2 = pnand %p2368_p1, %p2365_p0 }
   0xc   :  { %2373 = shalt.err (!%p2370_p2)
}
   0xd   :  { %s2374_s30 = scalar_lea.vmem %s37_s22, 25088  ;;  %p2379_p4 = scmp.lt.s32.totalorder %s37_s22, %s37_s22 }
   0xe   :  { %p2375_p3 = scmp.ne.s32.totalorder %s37_s22, %s2374_s30  ;;  %p2380_p5 = scmp.lt.s32.totalorder %s2374_s30, %s2374_s30 }
  0x10   :  { %p2381_p6 = por %p2380_p5, %p2379_p4 }
  0x12   :  { %p2382_p7 = pnand %p2381_p6, %p2375_p3 }
  0x14   :  { %2385 = shalt.err (!%p2382_p7)
}
  0x15   :  { %s2507_s0 = smov 512   ;;  %s2508_s17 = smov 32  }
  0x16   :  { %42 = dma.hbm_to_vmem [thread:$0]  %s3144_s2, 25088, %s37_s22, [#allocation3], %s2507_s0, %s2507_s0, %s2508_s17  }
  0x17   :  { %s2509_s20 = smov [#allocation5]   ;;  %s2386_s25 = scalar_lea.hbm %s3145_s3, 25088 }
  0x18   :  { %s48_s21 = sshll.u32 %s2509_s20, 4  ;;  %p2387_p8 = scmp.ne.s32.totalorder %s3145_s3, %s2386_s25  ;;  %s49_s21 = int_to_ptr.vmem [resolvable:$true] %s48_s21 }
  0x19   :  { %p2390_p9 = scmp.lt.u32.totalorder %s2386_s25, %s3145_s3 }
  0x1b   :  { %p2392_p10 = pnand %p2390_p9, %p2387_p8 }
  0x1d   :  { %2395 = shalt.err (!%p2392_p10)
}
  0x1e   :  { %s2396_s30 = scalar_lea.vmem %s49_s21, 25088  ;;  %p2401_p12 = scmp.lt.s32.totalorder %s49_s21, %s49_s21 }
  0x1f   :  { %p2397_p11 = scmp.ne.s32.totalorder %s49_s21, %s2396_s30  ;;  %p2402_p13 = scmp.lt.s32.totalorder %s2396_s30, %s2396_s30 }
  0x21   :  { %p2403_p0 = por %p2402_p13, %p2401_p12 }
  0x23   :  { %p2404_p1 = pnand %p2403_p0, %p2397_p11 }
  0x25   :  { %2407 = shalt.err (!%p2404_p1)
}
  0x26   :  { %54 = dma.hbm_to_vmem [thread:$0]  %s3145_s3, 25088, %s49_s21, [#allocation6], %s2507_s0, %s2507_s0, %s2508_s17  }
  0x27   :  { %2496 = dma.done.wait [#allocation3], 25088  }
  0x28   :  { %2497 = vsyncadd [#allocation3], 4294942208 }
  0x29   :  { %2498 = dma.done.wait [#allocation6], 25088  }
  0x2a   :  { %2499 = vsyncadd [#allocation6], 4294942208  ;;  %v81_v0 = vld [vmem:[#allocation2 + $0x8] sm:$0xff]  ;;  %v83_v2 = vld [vmem:[#allocation2 + $0x18] sm:$0xff]  ;;  %s3160_s17 = sld [smem:[#allocation18_spill]]  ;;  %vm319_vm0 = vcmask 64512  }
  0x2b   :  { %v85_v1 = vld [vmem:[#allocation2 + $0x28] sm:$0xff]  ;;  %v87_v4 = vld [vmem:[#allocation2 + $0x38] sm:$0xff]  ;;  %v80_v5 = vld [vmem:[#allocation2] sm:$0xff]  ;;  %vm684_vm1 = vcmask 1041408   ;;  %vm685_vm2 = vcmask 1043458   ;;  %vm687_vm4 = vcmask 1045508  }
  0x2c   :  { %v1835_v3 = vpack.c.bf16 %v85_v1, %v81_v0  ;;  %v84_v6 = vld [vmem:[#allocation2 + $0x20] sm:$0xff]  ;;  %v1931_v7 = vpack.c.bf16 %v87_v4, %v83_v2  ;;  %v82_v9 = vld [vmem:[#allocation2 + $0x10] sm:$0xff]  ;;  %v89_v11 = vld [vmem:[#allocation2 + $0x48] sm:$0xff]  ;;  %vm689_vm6 = vcmask 64518   ;;  %vm1687_vm8 = vcmask 74752   ;;  %s2514_s19 = smov [#allocation7]  }
  0x2d   :  { %v1837_v8 = vpack.c.bf16 %v84_v6, %v80_v5  ;;  %v86_v10 = vld [vmem:[#allocation2 + $0x30] sm:$0xff]  ;;  %v93_v13 = vld [vmem:[#allocation2 + $0x68] sm:$0xff]  ;;  %v91_v14 = vld [vmem:[#allocation2 + $0x58] sm:$0xff] }
  0x2e   :  { %1836 = vmatprep.subr.bf16.mxu0 %v1835_v3  ;;  %v1933_v12 = vpack.c.bf16 %v86_v10, %v82_v9  ;;  %v95_v15 = vld [vmem:[#allocation2 + $0x78] sm:$0xff]  ;;  %1932 = vmatprep.subr.bf16.mxu1 %v1931_v7  ;;  %v1839_v16 = vpack.c.bf16 %v93_v13, %v89_v11  ;;  %v88_v18 = vld [vmem:[#allocation2 + $0x40] sm:$0xff]  ;;  %v90_v20 = vld [vmem:[#allocation2 + $0x50] sm:$0xff] }
  0x2f   :  { %1838 = vmatpush1.bf16.msra.mxu0 %v1837_v8  ;;  %v1935_v17 = vpack.c.bf16 %v95_v15, %v91_v14  ;;  %v92_v19 = vld [vmem:[#allocation2 + $0x60] sm:$0xff]  ;;  %v94_v22 = vld [vmem:[#allocation2 + $0x70] sm:$0xff]  ;;  %v97_v23 = vld [vmem:[#allocation2 + $0x88] sm:$0xff] }
  0x30   :  { %1934 = vmatpush1.bf16.msra.mxu1 %v1933_v12  ;;  %v1841_v21 = vpack.c.bf16 %v92_v19, %v88_v18  ;;  %v101_v24 = vld [vmem:[#allocation2 + $0xa8] sm:$0xff]  ;;  %1840 = vmatprep.subr.bf16.mxu0 %v1839_v16  ;;  %v1937_v25 = vpack.c.bf16 %v94_v22, %v90_v20  ;;  %v99_v27 = vld [vmem:[#allocation2 + $0x98] sm:$0xff]  ;;  %v96_v29 = vld [vmem:[#allocation2 + $0x80] sm:$0xff] }
  0x31   :  { %1936 = vmatprep.subr.bf16.mxu1 %v1935_v17  ;;  %v1843_v26 = vpack.c.bf16 %v101_v24, %v97_v23  ;;  %v103_v28 = vld [vmem:[#allocation2 + $0xb8] sm:$0xff]  ;;  %v100_v31 = vld [vmem:[#allocation2 + $0xa0] sm:$0xff]  ;;  %v98_v32 = vld [vmem:[#allocation2 + $0x90] sm:$0xff] }
  0x32   :  { %v1939_v30 = vpack.c.bf16 %v103_v28, %v99_v27  ;;  %v102_v33 = vld [vmem:[#allocation2 + $0xb0] sm:$0xff]  ;;  %v1845_v34 = vpack.c.bf16 %v100_v31, %v96_v29  ;;  %v105_v35 = vld [vmem:[#allocation2 + $0xc8] sm:$0xff]  ;;  %v107_v37 = vld [vmem:[#allocation2 + $0xd8] sm:$0xff] }
  0x33   :  { %1842 = vmatpush1.bf16.msra.mxu0 %v1841_v21  ;;  %v109_v36 = vld [vmem:[#allocation2 + $0xe8] sm:$0xff]  ;;  %v1941_v38 = vpack.c.bf16 %v102_v33, %v98_v32  ;;  %v111_v40 = vld [vmem:[#allocation2 + $0xf8] sm:$0xff]  ;;  %v104_v41 = vld [vmem:[#allocation2 + $0xc0] sm:$0xff] }
  0x34   :  { %1938 = vmatpush1.bf16.msra.mxu1 %v1937_v25  ;;  %1844 = vmatprep.subr.bf16.mxu0 %v1843_v26  ;;  %v1847_v39 = vpack.c.bf16 %v109_v36, %v105_v35  ;;  %v108_v42 = vld [vmem:[#allocation2 + $0xe0] sm:$0xff]  ;;  %v1943_v43 = vpack.c.bf16 %v111_v40, %v107_v37  ;;  %v106_v44 = vld [vmem:[#allocation2 + $0xd0] sm:$0xff]  ;;  %v113_v46 = vld [vmem:[#allocation2 + $0x108] sm:$0xff] }
  0x35   :  { %1940 = vmatprep.subr.bf16.mxu1 %v1939_v30  ;;  %v110_v45 = vld [vmem:[#allocation2 + $0xf0] sm:$0xff]  ;;  %v117_v47 = vld [vmem:[#allocation2 + $0x128] sm:$0xff]  ;;  %v115_v48 = vld [vmem:[#allocation2 + $0x118] sm:$0xff]  ;;  %v1849_v50 = vpack.c.bf16 %v108_v42, %v104_v41 }
  0x36   :  { %v119_v49 = vld [vmem:[#allocation2 + $0x138] sm:$0xff]  ;;  %v1945_v51 = vpack.c.bf16 %v110_v45, %v106_v44  ;;  %v1851_v52 = vpack.c.bf16 %v117_v47, %v113_v46  ;;  %v112_v53 = vld [vmem:[#allocation2 + $0x100] sm:$0xff]  ;;  %v114_v55 = vld [vmem:[#allocation2 + $0x110] sm:$0xff]  ;;  %v278_v46 = vlaneseq  ;;  %v2510_v47 = vmov 1983009808  }
  0x37   :  { %1846 = vmatpush1.bf16.msra.mxu0 %v1845_v34  ;;  %v116_v54 = vld [vmem:[#allocation2 + $0x120] sm:$0xff]  ;;  %v1947_v56 = vpack.c.bf16 %v119_v49, %v115_v48  ;;  %v118_v57 = vld [vmem:[#allocation2 + $0x130] sm:$0xff]  ;;  %v121_v58 = vld [vmem:[#allocation2 + $0x148] sm:$0xff]  ;;  %v301_v48 = vunpack.c.l.s4 %v2510_v47 }
  0x38   :  { %1942 = vmatpush1.bf16.msra.mxu1 %v1941_v38  ;;  %1848 = vmatprep.subr.bf16.mxu0 %v1847_v39  ;;  %v125_v59 = vld [vmem:[#allocation2 + $0x168] sm:$0xff]  ;;  %v123_v60 = vld [vmem:[#allocation2 + $0x158] sm:$0xff]  ;;  %v1853_v62 = vpack.c.bf16 %v116_v54, %v112_v53  ;;  %v1949_v63 = vpack.c.bf16 %v118_v57, %v114_v55  ;;  %v120_v1 = vld [vmem:[#allocation2 + $0x140] sm:$0xff] }
  0x39   :  { %1944 = vmatprep.subr.bf16.mxu1 %v1943_v43  ;;  %v127_v61 = vld [vmem:[#allocation2 + $0x178] sm:$0xff]  ;;  %v1855_v0 = vpack.c.bf16 %v125_v59, %v121_v58  ;;  %v124_v2 = vld [vmem:[#allocation2 + $0x160] sm:$0xff]  ;;  %v122_v3 = vld [vmem:[#allocation2 + $0x150] sm:$0xff] }
  0x3a   :  { %v1951_v4 = vpack.c.bf16 %v127_v61, %v123_v60  ;;  %v126_v5 = vld [vmem:[#allocation2 + $0x170] sm:$0xff]  ;;  %v129_v6 = vld [vmem:[#allocation2 + $0x188] sm:$0xff]  ;;  %v131_v8 = vld [vmem:[#allocation2 + $0x198] sm:$0xff]  ;;  %v1857_v10 = vpack.c.bf16 %v124_v2, %v120_v1  ;;  %v2626_v61 = vshrl.u32 %v278_v46, 7 }
  0x3b   :  { %1850 = vmatpush1.bf16.msra.mxu0 %v1849_v50  ;;  %v133_v7 = vld [vmem:[#allocation2 + $0x1a8] sm:$0xff]  ;;  %v135_v9 = vld [vmem:[#allocation2 + $0x1b8] sm:$0xff]  ;;  %v1953_v11 = vpack.c.bf16 %v126_v5, %v122_v3  ;;  %v128_v13 = vld [vmem:[#allocation2 + $0x180] sm:$0xff] }
  0x3c   :  { %1946 = vmatpush1.bf16.msra.mxu1 %v1945_v51  ;;  %1852 = vmatprep.subr.bf16.mxu0 %v1851_v52  ;;  %v1859_v12 = vpack.c.bf16 %v133_v7, %v129_v6  ;;  %v132_v14 = vld [vmem:[#allocation2 + $0x1a0] sm:$0xff]  ;;  %v130_v15 = vld [vmem:[#allocation2 + $0x190] sm:$0xff]  ;;  %v1955_v16 = vpack.c.bf16 %v135_v9, %v131_v8  ;;  %v137_v18 = vld [vmem:[#allocation2 + $0x1c8] sm:$0xff] }
  0x3d   :  { %1948 = vmatprep.subr.bf16.mxu1 %v1947_v56  ;;  %v134_v17 = vld [vmem:[#allocation2 + $0x1b0] sm:$0xff]  ;;  %v141_v19 = vld [vmem:[#allocation2 + $0x1e8] sm:$0xff]  ;;  %v139_v20 = vld [vmem:[#allocation2 + $0x1d8] sm:$0xff]  ;;  %v1861_v22 = vpack.c.bf16 %v132_v14, %v128_v13 }
  0x3e   :  { %v143_v21 = vld [vmem:[#allocation2 + $0x1f8] sm:$0xff]  ;;  %v1957_v23 = vpack.c.bf16 %v134_v17, %v130_v15  ;;  %v1863_v24 = vpack.c.bf16 %v141_v19, %v137_v18  ;;  %v136_v25 = vld [vmem:[#allocation2 + $0x1c0] sm:$0xff]  ;;  %v138_v27 = vld [vmem:[#allocation2 + $0x1d0] sm:$0xff] }
  0x3f   :  { %1854 = vmatpush1.bf16.msra.mxu0 %v1853_v62  ;;  %v140_v26 = vld [vmem:[#allocation2 + $0x1e0] sm:$0xff]  ;;  %v1959_v28 = vpack.c.bf16 %v143_v21, %v139_v20  ;;  %v142_v29 = vld [vmem:[#allocation2 + $0x1f0] sm:$0xff]  ;;  %v145_v30 = vld [vmem:[#allocation2 + $0x208] sm:$0xff]  ;;  %v302_v62 = vunpack.c.0.s8 %v301_v48 }
  0x40   :  { %1950 = vmatpush1.bf16.msra.mxu1 %v1949_v63  ;;  %1856 = vmatprep.subr.bf16.mxu0 %v1855_v0  ;;  %v149_v31 = vld [vmem:[#allocation2 + $0x228] sm:$0xff]  ;;  %v147_v32 = vld [vmem:[#allocation2 + $0x218] sm:$0xff]  ;;  %v1865_v34 = vpack.c.bf16 %v140_v26, %v136_v25  ;;  %v1961_v35 = vpack.c.bf16 %v142_v29, %v138_v27  ;;  %v144_v37 = vld [vmem:[#allocation2 + $0x200] sm:$0xff] }
  0x41   :  { %1952 = vmatprep.subr.bf16.mxu1 %v1951_v4  ;;  %v151_v33 = vld [vmem:[#allocation2 + $0x238] sm:$0xff]  ;;  %v1867_v36 = vpack.c.bf16 %v149_v31, %v145_v30  ;;  %v148_v38 = vld [vmem:[#allocation2 + $0x220] sm:$0xff]  ;;  %v146_v39 = vld [vmem:[#allocation2 + $0x210] sm:$0xff] }
  0x42   :  { %v1963_v40 = vpack.c.bf16 %v151_v33, %v147_v32  ;;  %v150_v41 = vld [vmem:[#allocation2 + $0x230] sm:$0xff]  ;;  %v153_v42 = vld [vmem:[#allocation2 + $0x248] sm:$0xff]  ;;  %v155_v44 = vld [vmem:[#allocation2 + $0x258] sm:$0xff]  ;;  %v1869_v49 = vpack.c.bf16 %v148_v38, %v144_v37 }
  0x43   :  { %1858 = vmatpush1.bf16.msra.mxu0 %v1857_v10  ;;  %v157_v43 = vld [vmem:[#allocation2 + $0x268] sm:$0xff]  ;;  %v159_v45 = vld [vmem:[#allocation2 + $0x278] sm:$0xff]  ;;  %v1965_v50 = vpack.c.bf16 %v150_v41, %v146_v39  ;;  %v152_v52 = vld [vmem:[#allocation2 + $0x240] sm:$0xff] }
  0x44   :  { %1954 = vmatpush1.bf16.msra.mxu1 %v1953_v11  ;;  %1860 = vmatprep.subr.bf16.mxu0 %v1859_v12  ;;  %v1871_v51 = vpack.c.bf16 %v157_v43, %v153_v42  ;;  %v156_v53 = vld [vmem:[#allocation2 + $0x260] sm:$0xff]  ;;  %v154_v54 = vld [vmem:[#allocation2 + $0x250] sm:$0xff]  ;;  %v1967_v55 = vpack.c.bf16 %v159_v45, %v155_v44  ;;  %v161_v57 = vld [vmem:[#allocation2 + $0x288] sm:$0xff]  ;;  %v2629_v11 = vsub.s32 %v302_v62, %v2626_v61 }
  0x45   :  { %1956 = vmatprep.subr.bf16.mxu1 %v1955_v16  ;;  %v158_v56 = vld [vmem:[#allocation2 + $0x270] sm:$0xff]  ;;  %v165_v58 = vld [vmem:[#allocation2 + $0x2a8] sm:$0xff]  ;;  %v163_v59 = vld [vmem:[#allocation2 + $0x298] sm:$0xff]  ;;  %v1873_v63 = vpack.c.bf16 %v156_v53, %v152_v52 }
  0x46   :  { %v167_v60 = vld [vmem:[#allocation2 + $0x2b8] sm:$0xff]  ;;  %v1969_v0 = vpack.c.bf16 %v158_v56, %v154_v54  ;;  %v1875_v1 = vpack.c.bf16 %v165_v58, %v161_v57  ;;  %v160_v2 = vld [vmem:[#allocation2 + $0x280] sm:$0xff]  ;;  %v162_v4 = vld [vmem:[#allocation2 + $0x290] sm:$0xff] }
  0x47   :  { %1862 = vmatpush1.bf16.msra.mxu0 %v1861_v22  ;;  %v164_v3 = vld [vmem:[#allocation2 + $0x2a0] sm:$0xff]  ;;  %v1971_v5 = vpack.c.bf16 %v167_v60, %v163_v59  ;;  %v166_v6 = vld [vmem:[#allocation2 + $0x2b0] sm:$0xff]  ;;  %v169_v7 = vld [vmem:[#allocation2 + $0x2c8] sm:$0xff] }
  0x48   :  { %1958 = vmatpush1.bf16.msra.mxu1 %v1957_v23  ;;  %1864 = vmatprep.subr.bf16.mxu0 %v1863_v24  ;;  %v173_v8 = vld [vmem:[#allocation2 + $0x2e8] sm:$0xff]  ;;  %v171_v9 = vld [vmem:[#allocation2 + $0x2d8] sm:$0xff]  ;;  %v1877_v12 = vpack.c.bf16 %v164_v3, %v160_v2  ;;  %v168_v13 = vld [vmem:[#allocation2 + $0x2c0] sm:$0xff]  ;;  %v1973_v14 = vpack.c.bf16 %v166_v6, %v162_v4 }
  0x49   :  { %1960 = vmatprep.subr.bf16.mxu1 %v1959_v28  ;;  %v175_v10 = vld [vmem:[#allocation2 + $0x2f8] sm:$0xff]  ;;  %v1879_v15 = vpack.c.bf16 %v173_v8, %v169_v7  ;;  %v172_v16 = vld [vmem:[#allocation2 + $0x2e0] sm:$0xff]  ;;  %v170_v17 = vld [vmem:[#allocation2 + $0x2d0] sm:$0xff] }
  0x4a   :  { %v174_v18 = vld [vmem:[#allocation2 + $0x2f0] sm:$0xff]  ;;  %v1975_v19 = vpack.c.bf16 %v175_v10, %v171_v9  ;;  %v177_v20 = vld [vmem:[#allocation2 + $0x308] sm:$0xff]  ;;  %v2634_v22 = vld [vmem:[%s3160_s17] sm:$0xff]  ;;  %v1881_v26 = vpack.c.bf16 %v172_v16, %v168_v13 }
  0x4b   :  { %1866 = vmatpush1.bf16.msra.mxu0 %v1865_v34  ;;  %v181_v21 = vld [vmem:[#allocation2 + $0x328] sm:$0xff]  ;;  %v179_v23 = vld [vmem:[#allocation2 + $0x318] sm:$0xff]  ;;  %v2638_v25 = vrot.slane %v2634_v22, %v2629_v11  ;;  %v1977_v27 = vpack.c.bf16 %v174_v18, %v170_v17  ;;  %v176_v29 = vld [vmem:[#allocation2 + $0x300] sm:$0xff]  ;;  %v299_v8 = vcombine.high %v2634_v22, %v2634_v22 }
  0x4c   :  { %1962 = vmatpush1.bf16.msra.mxu1 %v1961_v35  ;;  %1868 = vmatprep.subr.bf16.mxu0 %v1867_v36  ;;  %v183_v24 = vld [vmem:[#allocation2 + $0x338] sm:$0xff]  ;;  %v1883_v28 = vpack.c.bf16 %v181_v21, %v177_v20  ;;  %v180_v30 = vld [vmem:[#allocation2 + $0x320] sm:$0xff]  ;;  %v178_v31 = vld [vmem:[#allocation2 + $0x310] sm:$0xff] }
  0x4d   :  { %1964 = vmatprep.subr.bf16.mxu1 %v1963_v40  ;;  %v314_v32 = vcombine.high %v2638_v25, %v2638_v25  ;;  %v1979_v33 = vpack.c.bf16 %v183_v24, %v179_v23  ;;  %v182_v34 = vld [vmem:[#allocation2 + $0x330] sm:$0xff]  ;;  %v185_v35 = vld [vmem:[#allocation2 + $0x348] sm:$0xff]  ;;  %v187_v37 = vld [vmem:[#allocation2 + $0x358] sm:$0xff]  ;;  %v1885_v39 = vpack.c.bf16 %v180_v30, %v176_v29  ;;  %v2645_v20 = vrot.slane %v299_v8, %v2629_v11 }
  0x4e   :  { %v189_v36 = vld [vmem:[#allocation2 + $0x368] sm:$0xff]  ;;  %v191_v38 = vld [vmem:[#allocation2 + $0x378] sm:$0xff]  ;;  %v1981_v40 = vpack.c.bf16 %v182_v34, %v178_v31  ;;  %v184_v42 = vld [vmem:[#allocation2 + $0x340] sm:$0xff] }
  0x4f   :  { %1870 = vmatpush1.bf16.msra.mxu0 %v1869_v49  ;;  %386 = vmatprep.mubr.f32.mxu0 %v314_v32  ;;  %v1887_v41 = vpack.c.bf16 %v189_v36, %v185_v35  ;;  %v188_v43 = vld [vmem:[#allocation2 + $0x360] sm:$0xff]  ;;  %v186_v44 = vld [vmem:[#allocation2 + $0x350] sm:$0xff]  ;;  %v1983_v45 = vpack.c.bf16 %v191_v38, %v187_v37  ;;  %v193_v47 = vld [vmem:[#allocation2 + $0x388] sm:$0xff]  ;;  %v315_v38 = vcombine.high %v2645_v20, %v2645_v20 }
  0x50   :  { %1966 = vmatpush1.bf16.msra.mxu1 %v1965_v50  ;;  %1872 = vmatprep.subr.bf16.mxu0 %v1871_v51  ;;  %v190_v46 = vld [vmem:[#allocation2 + $0x370] sm:$0xff]  ;;  %v197_v48 = vld [vmem:[#allocation2 + $0x3a8] sm:$0xff]  ;;  %v195_v49 = vld [vmem:[#allocation2 + $0x398] sm:$0xff]  ;;  %v1889_v51 = vpack.c.bf16 %v188_v43, %v184_v42 }
  0x51   :  { %1968 = vmatprep.subr.bf16.mxu1 %v1967_v55  ;;  %528 = vmatprep.mubr.f32.mxu1 %v314_v32  ;;  %v199_v50 = vld [vmem:[#allocation2 + $0x3b8] sm:$0xff]  ;;  %v1985_v52 = vpack.c.bf16 %v190_v46, %v186_v44  ;;  %v1891_v53 = vpack.c.bf16 %v197_v48, %v193_v47  ;;  %v192_v54 = vld [vmem:[#allocation2 + $0x380] sm:$0xff]  ;;  %v194_v56 = vld [vmem:[#allocation2 + $0x390] sm:$0xff] }
  0x52   :  { %v196_v55 = vld [vmem:[#allocation2 + $0x3a0] sm:$0xff]  ;;  %v1987_v57 = vpack.c.bf16 %v199_v50, %v195_v49  ;;  %v198_v58 = vld [vmem:[#allocation2 + $0x3b0] sm:$0xff]  ;;  %v201_v59 = vld [vmem:[#allocation2 + $0x3c8] sm:$0xff] }
  0x53   :  { %1874 = vmatpush1.bf16.msra.mxu0 %v1873_v63  ;;  %v205_v60 = vld [vmem:[#allocation2 + $0x3e8] sm:$0xff]  ;;  %v203_v62 = vld [vmem:[#allocation2 + $0x3d8] sm:$0xff]  ;;  %v200_v3 = vld [vmem:[#allocation2 + $0x3c0] sm:$0xff] }
  0x54   :  { %1970 = vmatpush1.bf16.msra.mxu1 %v1969_v0  ;;  %1876 = vmatprep.subr.bf16.mxu0 %v1875_v1  ;;  %v207_v63 = vld [vmem:[#allocation2 + $0x3f8] sm:$0xff]  ;;  %v1893_v0 = vpack.c.bf16 %v196_v55, %v192_v54  ;;  %v1989_v1 = vpack.c.bf16 %v198_v58, %v194_v56  ;;  %v1895_v2 = vpack.c.bf16 %v205_v60, %v201_v59  ;;  %v204_v4 = vld [vmem:[#allocation2 + $0x3e0] sm:$0xff]  ;;  %v206_v7 = vld [vmem:[#allocation2 + $0x3f0] sm:$0xff] }
  0x55   :  { %1972 = vmatprep.subr.bf16.mxu1 %v1971_v5  ;;  %v202_v5 = vld [vmem:[#allocation2 + $0x3d0] sm:$0xff]  ;;  %v1991_v6 = vpack.c.bf16 %v207_v63, %v203_v62  ;;  %v209_v9 = vld [vmem:[#allocation2 + $0x408] sm:$0xff]  ;;  %v215_v13 = vld [vmem:[#allocation2 + $0x438] sm:$0xff] }
  0x56   :  { %v213_v10 = vld [vmem:[#allocation2 + $0x428] sm:$0xff]  ;;  %v208_v17 = vld [vmem:[#allocation2 + $0x400] sm:$0xff]  ;;  %v214_v23 = vld [vmem:[#allocation2 + $0x430] sm:$0xff] }
  0x57   :  { %1878 = vmatpush1.bf16.msra.mxu0 %v1877_v12  ;;  %v211_v12 = vld [vmem:[#allocation2 + $0x418] sm:$0xff]  ;;  %v1899_v16 = vpack.c.bf16 %v213_v10, %v209_v9  ;;  %v212_v18 = vld [vmem:[#allocation2 + $0x420] sm:$0xff]  ;;  %v217_v22 = vld [vmem:[#allocation2 + $0x448] sm:$0xff] }
  0x58   :  { %1974 = vmatpush1.bf16.msra.mxu1 %v1973_v14  ;;  %1880 = vmatprep.subr.bf16.mxu0 %v1879_v15  ;;  %v1897_v14 = vpack.c.bf16 %v204_v4, %v200_v3  ;;  %v1993_v15 = vpack.c.bf16 %v206_v7, %v202_v5  ;;  %v1995_v21 = vpack.c.bf16 %v215_v13, %v211_v12  ;;  %v221_v24 = vld [vmem:[#allocation2 + $0x468] sm:$0xff]  ;;  %v216_v31 = vld [vmem:[#allocation2 + $0x440] sm:$0xff]  ;;  %v222_v35 = vld [vmem:[#allocation2 + $0x470] sm:$0xff] }
  0x59   :  { %1976 = vmatprep.subr.bf16.mxu1 %v1975_v19  ;;  %v210_v19 = vld [vmem:[#allocation2 + $0x410] sm:$0xff]  ;;  %v1903_v30 = vpack.c.bf16 %v221_v24, %v217_v22  ;;  %v220_v32 = vld [vmem:[#allocation2 + $0x460] sm:$0xff]  ;;  %v225_v36 = vld [vmem:[#allocation2 + $0x488] sm:$0xff] }
  0x5a   :  { %v1997_v29 = vpack.c.bf16 %v214_v23, %v210_v19  ;;  %v229_v37 = vld [vmem:[#allocation2 + $0x4a8] sm:$0xff]  ;;  %v224_v44 = vld [vmem:[#allocation2 + $0x480] sm:$0xff]  ;;  %v226_v46 = vld [vmem:[#allocation2 + $0x490] sm:$0xff] }
  0x5b   :  { %1882 = vmatpush1.bf16.msra.mxu0 %v1881_v26  ;;  %v219_v26 = vld [vmem:[#allocation2 + $0x458] sm:$0xff]  ;;  %v1907_v43 = vpack.c.bf16 %v229_v37, %v225_v36  ;;  %v230_v48 = vld [vmem:[#allocation2 + $0x4b0] sm:$0xff]  ;;  %v233_v49 = vld [vmem:[#allocation2 + $0x4c8] sm:$0xff] }
  0x5c   :  { %1978 = vmatpush1.bf16.msra.mxu1 %v1977_v27  ;;  %1884 = vmatprep.subr.bf16.mxu0 %v1883_v28  ;;  %v223_v27 = vld [vmem:[#allocation2 + $0x478] sm:$0xff]  ;;  %v1901_v28 = vpack.c.bf16 %v212_v18, %v208_v17  ;;  %v237_v50 = vld [vmem:[#allocation2 + $0x4e8] sm:$0xff]  ;;  %v232_v55 = vld [vmem:[#allocation2 + $0x4c0] sm:$0xff] }
  0x5d   :  { %1980 = vmatprep.subr.bf16.mxu1 %v1979_v33  ;;  %v218_v33 = vld [vmem:[#allocation2 + $0x450] sm:$0xff]  ;;  %v1999_v34 = vpack.c.bf16 %v223_v27, %v219_v26  ;;  %v1911_v54 = vpack.c.bf16 %v237_v50, %v233_v49  ;;  %v236_v56 = vld [vmem:[#allocation2 + $0x4e0] sm:$0xff]  ;;  %v241_v60 = vld [vmem:[#allocation2 + $0x508] sm:$0xff] }
  0x5e   :  { %v2001_v42 = vpack.c.bf16 %v222_v35, %v218_v33  ;;  %v238_v59 = vld [vmem:[#allocation2 + $0x4f0] sm:$0xff]  ;;  %v245_v62 = vld [vmem:[#allocation2 + $0x528] sm:$0xff]  ;;  %v243_v63 = vld [vmem:[#allocation2 + $0x518] sm:$0xff] }
  0x5f   :  { %1886 = vmatpush1.bf16.msra.mxu0 %v1885_v39  ;;  %v227_v39 = vld [vmem:[#allocation2 + $0x498] sm:$0xff]  ;;  %v1915_v3 = vpack.c.bf16 %v245_v62, %v241_v60  ;;  %v240_v4 = vld [vmem:[#allocation2 + $0x500] sm:$0xff]  ;;  %v246_v8 = vld [vmem:[#allocation2 + $0x530] sm:$0xff] }
  0x60   :  { %1982 = vmatpush1.bf16.msra.mxu1 %v1981_v40  ;;  %1888 = vmatprep.subr.bf16.mxu0 %v1887_v41  ;;  %v231_v40 = vld [vmem:[#allocation2 + $0x4b8] sm:$0xff]  ;;  %v1905_v41 = vpack.c.bf16 %v220_v32, %v216_v31  ;;  %v244_v5 = vld [vmem:[#allocation2 + $0x520] sm:$0xff]  ;;  %v249_v9 = vld [vmem:[#allocation2 + $0x548] sm:$0xff] }
  0x61   :  { %1984 = vmatprep.subr.bf16.mxu1 %v1983_v45  ;;  %v228_v45 = vld [vmem:[#allocation2 + $0x4a0] sm:$0xff]  ;;  %v2003_v47 = vpack.c.bf16 %v231_v40, %v227_v39  ;;  %v253_v10 = vld [vmem:[#allocation2 + $0x568] sm:$0xff]  ;;  %v251_v12 = vld [vmem:[#allocation2 + $0x558] sm:$0xff] }
  0x62   :  { %v255_v13 = vld [vmem:[#allocation2 + $0x578] sm:$0xff]  ;;  %v248_v17 = vld [vmem:[#allocation2 + $0x540] sm:$0xff]  ;;  %v250_v19 = vld [vmem:[#allocation2 + $0x550] sm:$0xff] }
  0x63   :  { %1890 = vmatpush1.bf16.msra.mxu0 %v1889_v51  ;;  %v235_v51 = vld [vmem:[#allocation2 + $0x4d8] sm:$0xff]  ;;  %v252_v18 = vld [vmem:[#allocation2 + $0x560] sm:$0xff]  ;;  %v254_v23 = vld [vmem:[#allocation2 + $0x570] sm:$0xff] }
  0x64   :  { %1986 = vmatpush1.bf16.msra.mxu1 %v1985_v52  ;;  %1892 = vmatprep.subr.bf16.mxu0 %v1891_v53  ;;  %v239_v52 = vld [vmem:[#allocation2 + $0x4f8] sm:$0xff]  ;;  %v2005_v53 = vpack.c.bf16 %v230_v48, %v226_v46  ;;  %v257_v22 = vld [vmem:[#allocation2 + $0x588] sm:$0xff]  ;;  %v256_v31 = vld [vmem:[#allocation2 + $0x580] sm:$0xff] }
  0x65   :  { %1988 = vmatprep.subr.bf16.mxu1 %v1987_v57  ;;  %v234_v57 = vld [vmem:[#allocation2 + $0x4d0] sm:$0xff]  ;;  %v2007_v58 = vpack.c.bf16 %v239_v52, %v235_v51  ;;  %v261_v24 = vld [vmem:[#allocation2 + $0x5a8] sm:$0xff]  ;;  %v259_v26 = vld [vmem:[#allocation2 + $0x598] sm:$0xff] }
  0x66   :  { %v263_v27 = vld [vmem:[#allocation2 + $0x5b8] sm:$0xff]  ;;  %v260_v32 = vld [vmem:[#allocation2 + $0x5a0] sm:$0xff]  ;;  %v258_v33 = vld [vmem:[#allocation2 + $0x590] sm:$0xff] }
  0x67   :  { %1894 = vmatpush1.bf16.msra.mxu0 %v1893_v0  ;;  %v247_v0 = vld [vmem:[#allocation2 + $0x538] sm:$0xff]  ;;  %v262_v35 = vld [vmem:[#allocation2 + $0x5b0] sm:$0xff]  ;;  %v265_v36 = vld [vmem:[#allocation2 + $0x5c8] sm:$0xff]  ;;  %v1925_v40 = vpack.c.bf16 %v260_v32, %v256_v31 }
  0x68   :  { %1990 = vmatpush1.bf16.msra.mxu1 %v1989_v1  ;;  %1896 = vmatprep.subr.bf16.mxu0 %v1895_v2  ;;  %v1913_v1 = vpack.c.bf16 %v236_v56, %v232_v55  ;;  %v2009_v2 = vpack.c.bf16 %v238_v59, %v234_v57  ;;  %v2011_v7 = vpack.c.bf16 %v247_v0, %v243_v63  ;;  %v269_v37 = vld [vmem:[#allocation2 + $0x5e8] sm:$0xff]  ;;  %v271_v39 = vld [vmem:[#allocation2 + $0x5f8] sm:$0xff]  ;;  %v266_v46 = vld [vmem:[#allocation2 + $0x5d0] sm:$0xff] }
  0x69   :  { %1992 = vmatprep.subr.bf16.mxu1 %v1991_v6  ;;  %v242_v6 = vld [vmem:[#allocation2 + $0x510] sm:$0xff]  ;;  %v273_v50 = vld [vmem:[#allocation2 + $0x608] sm:$0xff]  ;;  %v275_v51 = vld [vmem:[#allocation2 + $0x618] sm:$0xff] }
  0x6a   :  { %v743_v52 = vld [vmem:[#allocation5 + $0x8] sm:$0xff]  ;;  %v749_v55 = vld [vmem:[#allocation5 + $0x38] sm:$0xff]  ;;  %v742_v56 = vld [vmem:[#allocation5] sm:$0xff] }
  0x6b   :  { %1898 = vmatpush1.bf16.msra.mxu0 %v1897_v14  ;;  %v1917_v14 = vpack.c.bf16 %v244_v5, %v240_v4  ;;  %v746_v57 = vld [vmem:[#allocation5 + $0x20] sm:$0xff]  ;;  %v748_v59 = vld [vmem:[#allocation5 + $0x30] sm:$0xff]  ;;  %v751_v60 = vld [vmem:[#allocation5 + $0x48] sm:$0xff] }
  0x6c   :  { %1994 = vmatpush1.bf16.msra.mxu1 %v1993_v15  ;;  %1900 = vmatprep.subr.bf16.mxu0 %v1899_v16  ;;  %v2013_v15 = vpack.c.bf16 %v246_v8, %v242_v6  ;;  %v1919_v16 = vpack.c.bf16 %v253_v10, %v249_v9  ;;  %v755_v62 = vld [vmem:[#allocation5 + $0x68] sm:$0xff]  ;;  %v274_v63 = vld [vmem:[#allocation2 + $0x610] sm:$0xff]  ;;  %v2029_v4 = vpack.c.bf16 %v746_v57, %v742_v56  ;;  %v754_v8 = vld [vmem:[#allocation5 + $0x60] sm:$0xff] }
  0x6d   :  { %1996 = vmatprep.subr.bf16.mxu1 %v1995_v21  ;;  %v2015_v21 = vpack.c.bf16 %v255_v13, %v251_v12  ;;  %v2031_v6 = vpack.c.bf16 %v755_v62, %v751_v60  ;;  %v752_v9 = vld [vmem:[#allocation5 + $0x50] sm:$0xff]  ;;  %v759_v13 = vld [vmem:[#allocation5 + $0x88] sm:$0xff]  ;;  %v766_v31 = vld [vmem:[#allocation5 + $0xc0] sm:$0xff] }
  0x6e   :  { %387 = vmatmul.mubr.f32.vlgmr.msra.gmra.mrb[0].mxu0 %v2638_v25  ;;  %v756_v12 = vld [vmem:[#allocation5 + $0x70] sm:$0xff]  ;;  %v786_v60 = vld [vmem:[#allocation5 + $0x160] sm:$0xff]  ;;  %vm686_vm3 = vmor %vm685_vm2, %vm684_vm1 }
  0x6f   :  { %1902 = vmatpush1.bf16.msra.mxu0 %v1901_v28  ;;  %529 = vmatmul.mubr.f32.vlgmr.msra.gmra.mrb[0].mxu1 %v2638_v25  ;;  %v1909_v25 = vpack.c.bf16 %v228_v45, %v224_v44  ;;  %v1921_v28 = vpack.c.bf16 %v252_v18, %v248_v17  ;;  %v268_v44 = vld [vmem:[#allocation2 + $0x5e0] sm:$0xff]  ;;  %v2129_v18 = vpack.c.bf16 %v756_v12, %v752_v9  ;;  %v784_v62 = vld [vmem:[#allocation5 + $0x150] sm:$0xff]  ;;  %vm688_vm5 = vmor %vm687_vm4, %vm686_vm3 }
  0x70   :  { %1998 = vmatpush1.bf16.msra.mxu1 %v1997_v29  ;;  %1904 = vmatprep.subr.bf16.mxu0 %v1903_v30  ;;  %v2017_v29 = vpack.c.bf16 %v254_v23, %v250_v19  ;;  %v1923_v30 = vpack.c.bf16 %v261_v24, %v257_v22  ;;  %v762_v23 = vld [vmem:[#allocation5 + $0xa0] sm:$0xff]  ;;  %v760_v22 = vld [vmem:[#allocation5 + $0x90] sm:$0xff]  ;;  %vm2897_vm7 = vmor %vm689_vm6, %vm688_vm5 }
  0x71   :  { %2000 = vmatprep.subr.bf16.mxu1 %v1999_v34  ;;  %1758 = vmatprep.mubr.msk.f32.mxu0 %vm319_vm0, %v315_v38  ;;  %v2019_v34 = vpack.c.bf16 %v263_v27, %v259_v26  ;;  %v764_v26 = vld [vmem:[#allocation5 + $0xb0] sm:$0xff]  ;;  %v767_v27 = vld [vmem:[#allocation5 + $0xc8] sm:$0xff]  ;;  %v794_v9 = vld [vmem:[#allocation5 + $0x1a0] sm:$0xff] }
  0x72   :  { %1759 = vmatprep.mubr.msk.f32.mxu1 %vm319_vm0, %v315_v38  ;;  %v267_v38 = vld [vmem:[#allocation2 + $0x5d8] sm:$0xff]  ;;  %v2133_v32 = vpack.c.bf16 %v764_v26, %v760_v22  ;;  %v802_v22 = vld [vmem:[#allocation5 + $0x1e0] sm:$0xff] }
  0x73   :  { %1906 = vmatpush1.bf16.msra.mxu0 %v1905_v41  ;;  %v2021_v41 = vpack.c.bf16 %v262_v35, %v258_v33  ;;  %v2023_v45 = vpack.c.bf16 %v271_v39, %v267_v38  ;;  %v768_v35 = vld [vmem:[#allocation5 + $0xd0] sm:$0xff]  ;;  %v775_v39 = vld [vmem:[#allocation5 + $0x108] sm:$0xff] }
  0x74   :  { %2002 = vmatpush1.bf16.msra.mxu1 %v2001_v42  ;;  %1908 = vmatprep.subr.bf16.mxu0 %v1907_v43  ;;  %v1927_v42 = vpack.c.bf16 %v269_v37, %v265_v36  ;;  %v264_v43 = vld [vmem:[#allocation2 + $0x5c0] sm:$0xff]  ;;  %v772_v38 = vld [vmem:[#allocation5 + $0xf0] sm:$0xff] }
  0x75   :  { %2004 = vmatprep.subr.bf16.mxu1 %v2003_v47  ;;  %v270_v47 = vld [vmem:[#allocation2 + $0x5f0] sm:$0xff]  ;;  %v1929_v48 = vpack.c.bf16 %v268_v44, %v264_v43  ;;  %v2658_v36 = vld [vmem:[%s3143_s1] sm:$0xff]  ;;  %v781_v43 = vld [vmem:[#allocation5 + $0x138] sm:$0xff] }
  0x76   :  { %v2025_v49 = vpack.c.bf16 %v270_v47, %v266_v46  ;;  %v2137_v46 = vpack.c.bf16 %v772_v38, %v768_v35  ;;  %v810_v35 = vld [vmem:[#allocation5 + $0x220] sm:$0xff] }
  0x77   :  { %1910 = vmatpush1.bf16.msra.mxu0 %v1909_v25  ;;  %v272_v25 = vld [vmem:[#allocation2 + $0x600] sm:$0xff] }
  0x78   :  { %2006 = vmatpush1.bf16.msra.mxu1 %v2005_v53  ;;  %1912 = vmatprep.subr.bf16.mxu0 %v1911_v54  ;;  %v747_v53 = vld [vmem:[#allocation5 + $0x28] sm:$0xff]  ;;  %v745_v54 = vld [vmem:[#allocation5 + $0x18] sm:$0xff] }
  0x79   :  { %2008 = vmatprep.subr.bf16.mxu1 %v2007_v58  ;;  %v744_v58 = vld [vmem:[#allocation5 + $0x10] sm:$0xff]  ;;  %v2027_v0 = vpack.c.bf16 %v747_v53, %v743_v52  ;;  %v787_v53 = vld [vmem:[#allocation5 + $0x168] sm:$0xff] }
  0x7a   :  { %v2125_v5 = vpack.c.bf16 %v748_v59, %v744_v58  ;;  %v780_v52 = vld [vmem:[#allocation5 + $0x130] sm:$0xff]  ;;  %v782_v59 = vld [vmem:[#allocation5 + $0x140] sm:$0xff] }
  0x7b   :  { %1914 = vmatpush1.bf16.msra.mxu0 %v1913_v1  ;;  %v753_v1 = vld [vmem:[#allocation5 + $0x58] sm:$0xff] }
  0x7c   :  { %2010 = vmatpush1.bf16.msra.mxu1 %v2009_v2  ;;  %1916 = vmatprep.subr.bf16.mxu0 %v1915_v3  ;;  %v757_v2 = vld [vmem:[#allocation5 + $0x78] sm:$0xff]  ;;  %v2123_v3 = vpack.c.bf16 %v749_v55, %v745_v54 }
  0x7d   :  { %2012 = vmatprep.subr.bf16.mxu1 %v2011_v7  ;;  %v750_v7 = vld [vmem:[#allocation5 + $0x40] sm:$0xff]  ;;  %v2127_v10 = vpack.c.bf16 %v757_v2, %v753_v1  ;;  %v785_v54 = vld [vmem:[#allocation5 + $0x158] sm:$0xff]  ;;  %v791_v1 = vld [vmem:[#allocation5 + $0x188] sm:$0xff] }
  0x7e   :  { %v2033_v17 = vpack.c.bf16 %v754_v8, %v750_v7  ;;  %v789_v55 = vld [vmem:[#allocation5 + $0x178] sm:$0xff]  ;;  %v795_v2 = vld [vmem:[#allocation5 + $0x1a8] sm:$0xff]  ;;  %v790_v8 = vld [vmem:[#allocation5 + $0x180] sm:$0xff] }
  0x7f   :  { %1918 = vmatpush1.bf16.msra.mxu0 %v1917_v14  ;;  %v763_v14 = vld [vmem:[#allocation5 + $0xa8] sm:$0xff]  ;;  %v2051_v7 = vpack.c.bf16 %v795_v2, %v791_v1 }
  0x80   :  { %2014 = vmatpush1.bf16.msra.mxu1 %v2013_v15  ;;  %1920 = vmatprep.subr.bf16.mxu0 %v1919_v16  ;;  %v761_v15 = vld [vmem:[#allocation5 + $0x98] sm:$0xff]  ;;  %v2035_v19 = vpack.c.bf16 %v763_v14, %v759_v13  ;;  %v796_v13 = vld [vmem:[#allocation5 + $0x1b0] sm:$0xff]  ;;  %v799_v14 = vld [vmem:[#allocation5 + $0x1c8] sm:$0xff] }
  0x81   :  { %2016 = vmatprep.subr.bf16.mxu1 %v2015_v21  ;;  %v765_v16 = vld [vmem:[#allocation5 + $0xb8] sm:$0xff]  ;;  %v758_v21 = vld [vmem:[#allocation5 + $0x80] sm:$0xff]  ;;  %v831_v1 = vld [vmem:[#allocation5 + $0x2c8] sm:$0xff] }
  0x82   :  { %v2131_v24 = vpack.c.bf16 %v765_v16, %v761_v15  ;;  %v803_v15 = vld [vmem:[#allocation5 + $0x1e8] sm:$0xff]  ;;  %v801_v16 = vld [vmem:[#allocation5 + $0x1d8] sm:$0xff] }
  0x83   :  { %1922 = vmatpush1.bf16.msra.mxu0 %v1921_v28  ;;  %v771_v28 = vld [vmem:[#allocation5 + $0xe8] sm:$0xff] }
  0x84   :  { %2018 = vmatpush1.bf16.msra.mxu1 %v2017_v29  ;;  %1924 = vmatprep.subr.bf16.mxu0 %v1923_v30  ;;  %v769_v29 = vld [vmem:[#allocation5 + $0xd8] sm:$0xff]  ;;  %v2037_v30 = vpack.c.bf16 %v762_v23, %v758_v21  ;;  %v2039_v33 = vpack.c.bf16 %v771_v28, %v767_v27  ;;  %v2055_v21 = vpack.c.bf16 %v803_v15, %v799_v14  ;;  %v798_v23 = vld [vmem:[#allocation5 + $0x1c0] sm:$0xff]  ;;  %v804_v27 = vld [vmem:[#allocation5 + $0x1f0] sm:$0xff] }
  0x85   :  { %2020 = vmatprep.subr.bf16.mxu1 %v2019_v34  ;;  %v770_v34 = vld [vmem:[#allocation5 + $0xe0] sm:$0xff]  ;;  %v807_v28 = vld [vmem:[#allocation5 + $0x208] sm:$0xff] }
  0x86   :  { %v2041_v44 = vpack.c.bf16 %v770_v34, %v766_v31  ;;  %v2057_v31 = vpack.c.bf16 %v802_v22, %v798_v23  ;;  %v806_v34 = vld [vmem:[#allocation5 + $0x200] sm:$0xff]  ;;  %v835_v2 = vld [vmem:[#allocation5 + $0x2e8] sm:$0xff] }
  0x87   :  { %1926 = vmatpush1.bf16.msra.mxu0 %v1925_v40  ;;  %v779_v40 = vld [vmem:[#allocation5 + $0x128] sm:$0xff]  ;;  %v838_v23 = vld [vmem:[#allocation5 + $0x300] sm:$0xff] }
  0x88   :  { %2022 = vmatpush1.bf16.msra.mxu1 %v2021_v41  ;;  %1928 = vmatprep.subr.bf16.mxu0 %v1927_v42  ;;  %v2662_v41 = vrot.slane %v2658_v36, %v2629_v11  ;;  %v777_v42 = vld [vmem:[#allocation5 + $0x118] sm:$0xff]  ;;  %v2043_v47 = vpack.c.bf16 %v779_v40, %v775_v39  ;;  %v812_v39 = vld [vmem:[#allocation5 + $0x230] sm:$0xff]  ;;  %v815_v40 = vld [vmem:[#allocation5 + $0x248] sm:$0xff] }
  0x89   :  { %2024 = vmatprep.subr.bf16.mxu1 %v2023_v45  ;;  %v839_v14 = vld [vmem:[#allocation5 + $0x308] sm:$0xff]  ;;  %v842_v22 = vld [vmem:[#allocation5 + $0x320] sm:$0xff] }
  0x8a   :  { %v976_v45 = vcombine.high %v2662_v41, %v2662_v41  ;;  %v843_v15 = vld [vmem:[#allocation5 + $0x328] sm:$0xff] }
  0x8b   :  { %1930 = vmatpush1.bf16.msra.mxu0 %v1929_v48  ;;  %v774_v48 = vld [vmem:[#allocation5 + $0x100] sm:$0xff] }
  0x8c   :  { %2026 = vmatpush1.bf16.msra.mxu1 %v2025_v49  ;;  %425 = vmatprep.subr.mxu0 %v273_v50  ;;  %v778_v49 = vld [vmem:[#allocation5 + $0x120] sm:$0xff]  ;;  %v776_v50 = vld [vmem:[#allocation5 + $0x110] sm:$0xff] }
  0x8d   :  { %567 = vmatprep.subr.mxu1 %v275_v51  ;;  %v2139_v51 = vpack.c.bf16 %v781_v43, %v777_v42  ;;  %v2045_v56 = vpack.c.bf16 %v778_v49, %v774_v48  ;;  %v2141_v57 = vpack.c.bf16 %v780_v52, %v776_v50  ;;  %v819_v42 = vld [vmem:[#allocation5 + $0x268] sm:$0xff]  ;;  %v817_v43 = vld [vmem:[#allocation5 + $0x258] sm:$0xff]  ;;  %v814_v48 = vld [vmem:[#allocation5 + $0x240] sm:$0xff] }
  0x8e   :  { %v818_v49 = vld [vmem:[#allocation5 + $0x260] sm:$0xff]  ;;  %v816_v50 = vld [vmem:[#allocation5 + $0x250] sm:$0xff] }
  0x8f   :  { %426 = vmatpush1.msra.mxu0 %v272_v25  ;;  %v783_v25 = vld [vmem:[#allocation5 + $0x148] sm:$0xff]  ;;  %v820_v52 = vld [vmem:[#allocation5 + $0x270] sm:$0xff] }
  0x90   :  { %568 = vmatpush1.msra.mxu1 %v274_v63  ;;  %458 = vmatmul.mubr.f32.vlgmr.msra.gmra.mrb[0].mxu0 %v2645_v20  ;;  %v2047_v58 = vpack.c.bf16 %v787_v53, %v783_v25  ;;  %v2143_v63 = vpack.c.bf16 %v789_v55, %v785_v54  ;;  %v823_v25 = vld [vmem:[#allocation5 + $0x288] sm:$0xff]  ;;  %v825_v54 = vld [vmem:[#allocation5 + $0x298] sm:$0xff] }
  0x91   :  { %600 = vmatmul.mubr.f32.vlgmr.msra.gmra.mrb[0].mxu1 %v2645_v20  ;;  %2028 = vmatprep.subr.bf16.mxu0 %v2027_v0  ;;  %v773_v20 = vld [vmem:[#allocation5 + $0xf8] sm:$0xff]  ;;  %v788_v0 = vld [vmem:[#allocation5 + $0x170] sm:$0xff]  ;;  %v827_v53 = vld [vmem:[#allocation5 + $0x2a8] sm:$0xff] }
  0x92   :  { %2124 = vmatprep.subr.bf16.mxu1 %v2123_v3  ;;  %2030 = vmatpush1.bf16.msra.mxu0 %v2029_v4  ;;  %v2135_v37 = vpack.c.bf16 %v773_v20, %v769_v29  ;;  %v793_v3 = vld [vmem:[#allocation5 + $0x198] sm:$0xff]  ;;  %v811_v29 = vld [vmem:[#allocation5 + $0x228] sm:$0xff] }
  0x93   :  { %2126 = vmatpush1.bf16.msra.mxu1 %v2125_v5  ;;  %2032 = vmatprep.subr.bf16.mxu0 %v2031_v6  ;;  %v797_v4 = vld [vmem:[#allocation5 + $0x1b8] sm:$0xff]  ;;  %v2049_v5 = vpack.c.bf16 %v786_v60, %v782_v59  ;;  %v2145_v6 = vpack.c.bf16 %v788_v0, %v784_v62  ;;  %v822_v59 = vld [vmem:[#allocation5 + $0x280] sm:$0xff]  ;;  %v824_v62 = vld [vmem:[#allocation5 + $0x290] sm:$0xff] }
  0x94   :  { %2128 = vmatprep.subr.bf16.mxu1 %v2127_v10  ;;  %1047 = vmatprep.mubr.f32.mxu0 %v976_v45  ;;  %v792_v10 = vld [vmem:[#allocation5 + $0x190] sm:$0xff]  ;;  %v2147_v12 = vpack.c.bf16 %v797_v4, %v793_v3  ;;  %v809_v20 = vld [vmem:[#allocation5 + $0x218] sm:$0xff]  ;;  %v826_v60 = vld [vmem:[#allocation5 + $0x2a0] sm:$0xff] }
  0x95   :  { %1189 = vmatprep.mubr.f32.mxu1 %v976_v45  ;;  %v2061_v45 = vpack.c.bf16 %v810_v35, %v806_v34  ;;  %v829_v55 = vld [vmem:[#allocation5 + $0x2b8] sm:$0xff]  ;;  %v828_v0 = vld [vmem:[#allocation5 + $0x2b0] sm:$0xff]  ;;  %v846_v34 = vld [vmem:[#allocation5 + $0x340] sm:$0xff] }
  0x96   :  { %2034 = vmatpush1.bf16.msra.mxu0 %v2033_v17  ;;  %v805_v17 = vld [vmem:[#allocation5 + $0x1f8] sm:$0xff]  ;;  %v850_v35 = vld [vmem:[#allocation5 + $0x360] sm:$0xff] }
  0x97   :  { %2130 = vmatpush1.bf16.msra.mxu1 %v2129_v18  ;;  %2036 = vmatprep.subr.bf16.mxu0 %v2035_v19  ;;  %v2053_v18 = vpack.c.bf16 %v794_v9, %v790_v8  ;;  %v2149_v19 = vpack.c.bf16 %v796_v13, %v792_v10  ;;  %v2151_v26 = vpack.c.bf16 %v805_v17, %v801_v16  ;;  %v833_v3 = vld [vmem:[#allocation5 + $0x2d8] sm:$0xff]  ;;  %v830_v8 = vld [vmem:[#allocation5 + $0x2c0] sm:$0xff]  ;;  %v832_v10 = vld [vmem:[#allocation5 + $0x2d0] sm:$0xff] }
  0x98   :  { %2132 = vmatprep.subr.bf16.mxu1 %v2131_v24  ;;  %v800_v24 = vld [vmem:[#allocation5 + $0x1d0] sm:$0xff]  ;;  %v837_v4 = vld [vmem:[#allocation5 + $0x2f8] sm:$0xff]  ;;  %v834_v9 = vld [vmem:[#allocation5 + $0x2e0] sm:$0xff] }
  0x99   :  { %v836_v13 = vld [vmem:[#allocation5 + $0x2f0] sm:$0xff]  ;;  %v841_v16 = vld [vmem:[#allocation5 + $0x318] sm:$0xff] }
  0x9a   :  { %2038 = vmatpush1.bf16.msra.mxu0 %v2037_v30  ;;  %v813_v30 = vld [vmem:[#allocation5 + $0x238] sm:$0xff] }
  0x9b   :  { %2134 = vmatpush1.bf16.msra.mxu1 %v2133_v32  ;;  %2040 = vmatprep.subr.bf16.mxu0 %v2039_v33  ;;  %v2153_v32 = vpack.c.bf16 %v804_v27, %v800_v24  ;;  %v2059_v33 = vpack.c.bf16 %v811_v29, %v807_v28  ;;  %v2155_v38 = vpack.c.bf16 %v813_v30, %v809_v20  ;;  %v845_v17 = vld [vmem:[#allocation5 + $0x338] sm:$0xff]  ;;  %v840_v24 = vld [vmem:[#allocation5 + $0x310] sm:$0xff]  ;;  %v847_v28 = vld [vmem:[#allocation5 + $0x348] sm:$0xff] }
  0x9c   :  { %2136 = vmatprep.subr.bf16.mxu1 %v2135_v37  ;;  %v808_v37 = vld [vmem:[#allocation5 + $0x210] sm:$0xff]  ;;  %v851_v29 = vld [vmem:[#allocation5 + $0x368] sm:$0xff]  ;;  %v849_v20 = vld [vmem:[#allocation5 + $0x358] sm:$0xff] }
  0x9d   :  { %v844_v27 = vld [vmem:[#allocation5 + $0x330] sm:$0xff]  ;;  %v853_v30 = vld [vmem:[#allocation5 + $0x378] sm:$0xff] }
  0x9e   :  { %2042 = vmatpush1.bf16.msra.mxu0 %v2041_v44  ;;  %v821_v44 = vld [vmem:[#allocation5 + $0x278] sm:$0xff] }
  0x9f   :  { %2138 = vmatpush1.bf16.msra.mxu1 %v2137_v46  ;;  %2044 = vmatprep.subr.bf16.mxu0 %v2043_v47  ;;  %v2157_v46 = vpack.c.bf16 %v812_v39, %v808_v37  ;;  %v2063_v47 = vpack.c.bf16 %v819_v42, %v815_v40  ;;  %v848_v37 = vld [vmem:[#allocation5 + $0x350] sm:$0xff]  ;;  %v855_v40 = vld [vmem:[#allocation5 + $0x388] sm:$0xff] }
  0xa0   :  { %2140 = vmatprep.subr.bf16.mxu1 %v2139_v51  ;;  %v2159_v51 = vpack.c.bf16 %v821_v44, %v817_v43  ;;  %v852_v39 = vld [vmem:[#allocation5 + $0x370] sm:$0xff]  ;;  %v859_v42 = vld [vmem:[#allocation5 + $0x3a8] sm:$0xff]  ;;  %v857_v43 = vld [vmem:[#allocation5 + $0x398] sm:$0xff] }
  0xa1   :  { %v861_v44 = vld [vmem:[#allocation5 + $0x3b8] sm:$0xff] }
  0xa2   :  { %2046 = vmatpush1.bf16.msra.mxu0 %v2045_v56  ;;  %v2065_v56 = vpack.c.bf16 %v818_v49, %v814_v48  ;;  %v854_v48 = vld [vmem:[#allocation5 + $0x380] sm:$0xff] }
  0xa3   :  { %2142 = vmatpush1.bf16.msra.mxu1 %v2141_v57  ;;  %2048 = vmatprep.subr.bf16.mxu0 %v2047_v58  ;;  %v2161_v57 = vpack.c.bf16 %v820_v52, %v816_v50  ;;  %v2067_v58 = vpack.c.bf16 %v827_v53, %v823_v25  ;;  %v858_v49 = vld [vmem:[#allocation5 + $0x3a0] sm:$0xff]  ;;  %v856_v50 = vld [vmem:[#allocation5 + $0x390] sm:$0xff]  ;;  %v863_v25 = vld [vmem:[#allocation5 + $0x3c8] sm:$0xff] }
  0xa4   :  { %2144 = vmatprep.subr.bf16.mxu1 %v2143_v63  ;;  %v2163_v63 = vpack.c.bf16 %v829_v55, %v825_v54  ;;  %v860_v52 = vld [vmem:[#allocation5 + $0x3b0] sm:$0xff]  ;;  %v867_v53 = vld [vmem:[#allocation5 + $0x3e8] sm:$0xff]  ;;  %v865_v54 = vld [vmem:[#allocation5 + $0x3d8] sm:$0xff] }
  0xa5   :  { %v869_v55 = vld [vmem:[#allocation5 + $0x3f8] sm:$0xff] }
  0xa6   :  { %2050 = vmatpush1.bf16.msra.mxu0 %v2049_v5  ;;  %v2069_v5 = vpack.c.bf16 %v826_v60, %v822_v59  ;;  %v862_v59 = vld [vmem:[#allocation5 + $0x3c0] sm:$0xff] }
  0xa7   :  { %2146 = vmatpush1.bf16.msra.mxu1 %v2145_v6  ;;  %2052 = vmatprep.subr.bf16.mxu0 %v2051_v7  ;;  %v2165_v6 = vpack.c.bf16 %v828_v0, %v824_v62  ;;  %v2071_v7 = vpack.c.bf16 %v835_v2, %v831_v1  ;;  %v866_v60 = vld [vmem:[#allocation5 + $0x3e0] sm:$0xff]  ;;  %v864_v62 = vld [vmem:[#allocation5 + $0x3d0] sm:$0xff]  ;;  %v961_v1 = vcombine.high %v2658_v36, %v2658_v36  ;;  %v871_v2 = vld [vmem:[#allocation5 + $0x408] sm:$0xff] }
  0xa8   :  { %2148 = vmatprep.subr.bf16.mxu1 %v2147_v12  ;;  %v2167_v12 = vpack.c.bf16 %v837_v4, %v833_v3  ;;  %v868_v0 = vld [vmem:[#allocation5 + $0x3f0] sm:$0xff]  ;;  %v875_v3 = vld [vmem:[#allocation5 + $0x428] sm:$0xff]  ;;  %v873_v4 = vld [vmem:[#allocation5 + $0x418] sm:$0xff] }
  0xa9   :  { %v2669_v36 = vrot.slane %v961_v1, %v2629_v11  ;;  %v908_v1 = vld [vmem:[#allocation5 + $0x530] sm:$0xff] }
  0xaa   :  { %2054 = vmatpush1.bf16.msra.mxu0 %v2053_v18  ;;  %v2073_v18 = vpack.c.bf16 %v834_v9, %v830_v8  ;;  %v2091_v8 = vpack.c.bf16 %v875_v3, %v871_v2  ;;  %v870_v9 = vld [vmem:[#allocation5 + $0x400] sm:$0xff]  ;;  %v911_v2 = vld [vmem:[#allocation5 + $0x548] sm:$0xff] }
  0xab   :  { %2150 = vmatpush1.bf16.msra.mxu1 %v2149_v19  ;;  %2056 = vmatprep.subr.bf16.mxu0 %v2055_v21  ;;  %v2169_v19 = vpack.c.bf16 %v836_v13, %v832_v10  ;;  %v2075_v21 = vpack.c.bf16 %v843_v15, %v839_v14  ;;  %v874_v10 = vld [vmem:[#allocation5 + $0x420] sm:$0xff]  ;;  %v876_v14 = vld [vmem:[#allocation5 + $0x430] sm:$0xff]  ;;  %v879_v15 = vld [vmem:[#allocation5 + $0x448] sm:$0xff] }
  0xac   :  { %2152 = vmatprep.subr.bf16.mxu1 %v2151_v26  ;;  %v2171_v26 = vpack.c.bf16 %v845_v17, %v841_v16  ;;  %v883_v16 = vld [vmem:[#allocation5 + $0x468] sm:$0xff]  ;;  %v881_v17 = vld [vmem:[#allocation5 + $0x458] sm:$0xff] }
  0xad   :  { %v915_v3 = vld [vmem:[#allocation5 + $0x568] sm:$0xff] }
  0xae   :  { %2058 = vmatpush1.bf16.msra.mxu0 %v2057_v31  ;;  %v2077_v31 = vpack.c.bf16 %v842_v22, %v838_v23  ;;  %v2095_v23 = vpack.c.bf16 %v883_v16, %v879_v15  ;;  %v878_v22 = vld [vmem:[#allocation5 + $0x440] sm:$0xff]  ;;  %v919_v15 = vld [vmem:[#allocation5 + $0x588] sm:$0xff] }
  0xaf   :  { %2154 = vmatpush1.bf16.msra.mxu1 %v2153_v32  ;;  %2060 = vmatprep.subr.bf16.mxu0 %v2059_v33  ;;  %v2173_v32 = vpack.c.bf16 %v844_v27, %v840_v24  ;;  %v2079_v33 = vpack.c.bf16 %v851_v29, %v847_v28  ;;  %v882_v24 = vld [vmem:[#allocation5 + $0x460] sm:$0xff]  ;;  %v884_v28 = vld [vmem:[#allocation5 + $0x470] sm:$0xff]  ;;  %v887_v29 = vld [vmem:[#allocation5 + $0x488] sm:$0xff] }
  0xb0   :  { %2156 = vmatprep.subr.bf16.mxu1 %v2155_v38  ;;  %v2175_v38 = vpack.c.bf16 %v853_v30, %v849_v20  ;;  %v891_v20 = vld [vmem:[#allocation5 + $0x4a8] sm:$0xff]  ;;  %v977_v30 = vcombine.high %v2669_v36, %v2669_v36 }
  0xb1   :  { %v923_v16 = vld [vmem:[#allocation5 + $0x5a8] sm:$0xff] }
  0xb2   :  { %2062 = vmatpush1.bf16.msra.mxu0 %v2061_v45  ;;  %v2081_v45 = vpack.c.bf16 %v850_v35, %v846_v34  ;;  %v2099_v35 = vpack.c.bf16 %v891_v20, %v887_v29  ;;  %v927_v29 = vld [vmem:[#allocation5 + $0x5c8] sm:$0xff] }
  0xb3   :  { %2158 = vmatpush1.bf16.msra.mxu1 %v2157_v46  ;;  %2064 = vmatprep.subr.bf16.mxu0 %v2063_v47  ;;  %v2177_v46 = vpack.c.bf16 %v852_v39, %v848_v37  ;;  %v2083_v47 = vpack.c.bf16 %v859_v42, %v855_v40  ;;  %v886_v37 = vld [vmem:[#allocation5 + $0x480] sm:$0xff]  ;;  %v888_v39 = vld [vmem:[#allocation5 + $0x490] sm:$0xff]  ;;  %v931_v20 = vld [vmem:[#allocation5 + $0x5e8] sm:$0xff] }
  0xb4   :  { %2160 = vmatprep.subr.bf16.mxu1 %v2159_v51  ;;  %v2179_v51 = vpack.c.bf16 %v861_v44, %v857_v43  ;;  %v892_v42 = vld [vmem:[#allocation5 + $0x4b0] sm:$0xff]  ;;  %v895_v43 = vld [vmem:[#allocation5 + $0x4c8] sm:$0xff] }
  0xb5   :  { %v899_v44 = vld [vmem:[#allocation5 + $0x4e8] sm:$0xff] }
  0xb6   :  { %2066 = vmatpush1.bf16.msra.mxu0 %v2065_v56  ;;  %v2085_v56 = vpack.c.bf16 %v858_v49, %v854_v48  ;;  %v2103_v48 = vpack.c.bf16 %v899_v44, %v895_v43  ;;  %v894_v49 = vld [vmem:[#allocation5 + $0x4c0] sm:$0xff]  ;;  %v935_v44 = vld [vmem:[#allocation5 + $0x608] sm:$0xff] }
  0xb7   :  { %2162 = vmatpush1.bf16.msra.mxu1 %v2161_v57  ;;  %2068 = vmatprep.subr.bf16.mxu0 %v2067_v58  ;;  %v2181_v57 = vpack.c.bf16 %v860_v52, %v856_v50  ;;  %v2087_v58 = vpack.c.bf16 %v867_v53, %v863_v25  ;;  %v898_v50 = vld [vmem:[#allocation5 + $0x4e0] sm:$0xff]  ;;  %v900_v25 = vld [vmem:[#allocation5 + $0x4f0] sm:$0xff]  ;;  %v903_v53 = vld [vmem:[#allocation5 + $0x508] sm:$0xff] }
  0xb8   :  { %2164 = vmatprep.subr.bf16.mxu1 %v2163_v63  ;;  %v2183_v63 = vpack.c.bf16 %v869_v55, %v865_v54  ;;  %v907_v54 = vld [vmem:[#allocation5 + $0x528] sm:$0xff]  ;;  %v905_v55 = vld [vmem:[#allocation5 + $0x518] sm:$0xff] }
  0xba   :  { %2070 = vmatpush1.bf16.msra.mxu0 %v2069_v5  ;;  %v877_v5 = vld [vmem:[#allocation5 + $0x438] sm:$0xff] }
  0xbb   :  { %2166 = vmatpush1.bf16.msra.mxu1 %v2165_v6  ;;  %2072 = vmatprep.subr.bf16.mxu0 %v2071_v7  ;;  %v2089_v6 = vpack.c.bf16 %v866_v60, %v862_v59  ;;  %v2185_v7 = vpack.c.bf16 %v868_v0, %v864_v62  ;;  %v2187_v13 = vpack.c.bf16 %v877_v5, %v873_v4  ;;  %v902_v60 = vld [vmem:[#allocation5 + $0x500] sm:$0xff]  ;;  %v913_v4 = vld [vmem:[#allocation5 + $0x558] sm:$0xff] }
  0xbc   :  { %2168 = vmatprep.subr.bf16.mxu1 %v2167_v12  ;;  %v872_v12 = vld [vmem:[#allocation5 + $0x410] sm:$0xff]  ;;  %v2107_v59 = vpack.c.bf16 %v907_v54, %v903_v53  ;;  %v906_v62 = vld [vmem:[#allocation5 + $0x520] sm:$0xff]  ;;  %v917_v5 = vld [vmem:[#allocation5 + $0x578] sm:$0xff] }
  0xbe   :  { %2074 = vmatpush1.bf16.msra.mxu0 %v2073_v18  ;;  %v885_v18 = vld [vmem:[#allocation5 + $0x478] sm:$0xff] }
  0xbf   :  { %2170 = vmatpush1.bf16.msra.mxu1 %v2169_v19  ;;  %2076 = vmatprep.subr.bf16.mxu0 %v2075_v21  ;;  %v2093_v19 = vpack.c.bf16 %v874_v10, %v870_v9  ;;  %v2189_v21 = vpack.c.bf16 %v876_v14, %v872_v12  ;;  %v2191_v27 = vpack.c.bf16 %v885_v18, %v881_v17  ;;  %v910_v9 = vld [vmem:[#allocation5 + $0x540] sm:$0xff]  ;;  %v912_v12 = vld [vmem:[#allocation5 + $0x550] sm:$0xff]  ;;  %v921_v17 = vld [vmem:[#allocation5 + $0x598] sm:$0xff] }
  0xc0   :  { %2172 = vmatprep.subr.bf16.mxu1 %v2171_v26  ;;  %v880_v26 = vld [vmem:[#allocation5 + $0x450] sm:$0xff]  ;;  %v914_v10 = vld [vmem:[#allocation5 + $0x560] sm:$0xff]  ;;  %v925_v18 = vld [vmem:[#allocation5 + $0x5b8] sm:$0xff] }
  0xc1   :  { %v2193_v34 = vpack.c.bf16 %v884_v28, %v880_v26  ;;  %v916_v14 = vld [vmem:[#allocation5 + $0x570] sm:$0xff] }
  0xc2   :  { %2078 = vmatpush1.bf16.msra.mxu0 %v2077_v31  ;;  %v889_v31 = vld [vmem:[#allocation5 + $0x498] sm:$0xff]  ;;  %v920_v26 = vld [vmem:[#allocation5 + $0x590] sm:$0xff] }
  0xc3   :  { %2174 = vmatpush1.bf16.msra.mxu1 %v2173_v32  ;;  %2080 = vmatprep.subr.bf16.mxu0 %v2079_v33  ;;  %v893_v32 = vld [vmem:[#allocation5 + $0x4b8] sm:$0xff]  ;;  %v2097_v33 = vpack.c.bf16 %v882_v24, %v878_v22  ;;  %v918_v22 = vld [vmem:[#allocation5 + $0x580] sm:$0xff]  ;;  %v924_v28 = vld [vmem:[#allocation5 + $0x5b0] sm:$0xff] }
  0xc4   :  { %2176 = vmatprep.subr.bf16.mxu1 %v2175_v38  ;;  %v890_v38 = vld [vmem:[#allocation5 + $0x4a0] sm:$0xff]  ;;  %v2195_v40 = vpack.c.bf16 %v893_v32, %v889_v31  ;;  %v933_v31 = vld [vmem:[#allocation5 + $0x5f8] sm:$0xff] }
  0xc5   :  { %v922_v24 = vld [vmem:[#allocation5 + $0x5a0] sm:$0xff] }
  0xc6   :  { %2082 = vmatpush1.bf16.msra.mxu0 %v2081_v45  ;;  %v897_v45 = vld [vmem:[#allocation5 + $0x4d8] sm:$0xff]  ;;  %v2117_v32 = vpack.c.bf16 %v922_v24, %v918_v22  ;;  %v1386_v22 = vld [vmem:[%s3153_s11 + $0x140] sm:$0xff]  ;;  %v1387_v24 = vld [vmem:[%s3153_s11 + $0x148] sm:$0xff] }
  0xc7   :  { %2178 = vmatpush1.bf16.msra.mxu1 %v2177_v46  ;;  %2084 = vmatprep.subr.bf16.mxu0 %v2083_v47  ;;  %v901_v46 = vld [vmem:[#allocation5 + $0x4f8] sm:$0xff]  ;;  %v2197_v47 = vpack.c.bf16 %v892_v42, %v888_v39  ;;  %v928_v39 = vld [vmem:[#allocation5 + $0x5d0] sm:$0xff] }
  0xc8   :  { %2180 = vmatprep.subr.bf16.mxu1 %v2179_v51  ;;  %v896_v51 = vld [vmem:[#allocation5 + $0x4d0] sm:$0xff]  ;;  %v2199_v52 = vpack.c.bf16 %v901_v46, %v897_v45  ;;  %v937_v45 = vld [vmem:[#allocation5 + $0x618] sm:$0xff]  ;;  %v934_v46 = vld [vmem:[#allocation5 + $0x600] sm:$0xff] }
  0xca   :  { %2086 = vmatpush1.bf16.msra.mxu0 %v2085_v56  ;;  %v909_v56 = vld [vmem:[#allocation5 + $0x538] sm:$0xff] }
  0xcb   :  { %2182 = vmatpush1.bf16.msra.mxu1 %v2181_v57  ;;  %2088 = vmatprep.subr.bf16.mxu0 %v2087_v58  ;;  %v2105_v57 = vpack.c.bf16 %v898_v50, %v894_v49  ;;  %v2201_v58 = vpack.c.bf16 %v900_v25, %v896_v51  ;;  %v2203_v0 = vpack.c.bf16 %v909_v56, %v905_v55  ;;  %v1363_v49 = vld [vmem:[%s3153_s11 + $0x88] sm:$0xff]  ;;  %v1346_v50 = vld [vmem:[%s3153_s11] sm:$0xff]  ;;  %v1364_v25 = vld [vmem:[%s3153_s11 + $0x90] sm:$0xff] }
  0xcc   :  { %2184 = vmatprep.subr.bf16.mxu1 %v2183_v63  ;;  %v904_v63 = vld [vmem:[#allocation5 + $0x510] sm:$0xff]  ;;  %v1347_v51 = vld [vmem:[%s3153_s11 + $0x8] sm:$0xff]  ;;  %v1365_v55 = vld [vmem:[%s3153_s11 + $0x98] sm:$0xff] }
  0xcd   :  { %v2221_v56 = vpack.c.bf16 %v1347_v51, %v1346_v50  ;;  %v1393_v50 = vld [vmem:[%s3153_s11 + $0x178] sm:$0xff] }
  0xce   :  { %2090 = vmatpush1.bf16.msra.mxu0 %v2089_v6  ;;  %v2109_v6 = vpack.c.bf16 %v906_v62, %v902_v60  ;;  %v1348_v60 = vld [vmem:[%s3153_s11 + $0x10] sm:$0xff]  ;;  %v1349_v62 = vld [vmem:[%s3153_s11 + $0x18] sm:$0xff] }
  0xcf   :  { %2186 = vmatpush1.bf16.msra.mxu1 %v2185_v7  ;;  %2092 = vmatprep.subr.bf16.mxu0 %v2091_v8  ;;  %v2205_v7 = vpack.c.bf16 %v908_v1, %v904_v63  ;;  %v2111_v8 = vpack.c.bf16 %v915_v3, %v911_v2  ;;  %v2511_v63 = vmov 0.0|0.0   ;;  %v1367_v1 = vld [vmem:[%s3153_s11 + $0xa8] sm:$0xff]  ;;  %v2225_v3 = vpack.c.bf16 %v1349_v62, %v1348_v60  ;;  %v1394_v60 = vld [vmem:[%s3153_s11 + $0x180] sm:$0xff] }
  0xd0   :  { %2188 = vmatprep.subr.bf16.mxu1 %v2187_v13  ;;  %v2207_v13 = vpack.c.bf16 %v917_v5, %v913_v4  ;;  %v1383_v4 = vld [vmem:[%s3153_s11 + $0x128] sm:$0xff] }
  0xd1   :  { %1048 = vmatmul.mubr.f32.vlgmr.msra.gmra.mrb[2].mxu0 %v2662_v41 }
  0xd2   :  { %2094 = vmatpush1.bf16.msra.mxu0 %v2093_v19  ;;  %1190 = vmatmul.mubr.f32.vlgmr.msra.gmra.mrb[2].mxu1 %v2662_v41  ;;  %v2101_v41 = vpack.c.bf16 %v890_v38, %v886_v37  ;;  %v2113_v19 = vpack.c.bf16 %v914_v10, %v910_v9  ;;  %v930_v37 = vld [vmem:[#allocation5 + $0x5e0] sm:$0xff]  ;;  %v1369_v9 = vld [vmem:[%s3153_s11 + $0xb8] sm:$0xff] }
  0xd3   :  { %2190 = vmatpush1.bf16.msra.mxu1 %v2189_v21  ;;  %2096 = vmatprep.subr.bf16.mxu0 %v2095_v23  ;;  %v2209_v21 = vpack.c.bf16 %v916_v14, %v912_v12  ;;  %v2115_v23 = vpack.c.bf16 %v923_v16, %v919_v15  ;;  %v1385_v14 = vld [vmem:[%s3153_s11 + $0x138] sm:$0xff]  ;;  %v1352_v16 = vld [vmem:[%s3153_s11 + $0x30] sm:$0xff] }
  0xd4   :  { %2192 = vmatprep.subr.bf16.mxu1 %v2191_v27  ;;  %1760 = vmatprep.mubr.msk.f32.mxu0 %vm319_vm0, %v977_v30  ;;  %v2211_v27 = vpack.c.bf16 %v925_v18, %v921_v17  ;;  %v1353_v17 = vld [vmem:[%s3153_s11 + $0x38] sm:$0xff]  ;;  %v1370_v18 = vld [vmem:[%s3153_s11 + $0xc0] sm:$0xff] }
  0xd5   :  { %1761 = vmatprep.mubr.msk.f32.mxu1 %vm319_vm0, %v977_v30  ;;  %v929_v30 = vld [vmem:[#allocation5 + $0x5d8] sm:$0xff] }
  0xd6   :  { %2098 = vmatpush1.bf16.msra.mxu0 %v2097_v33  ;;  %v2213_v33 = vpack.c.bf16 %v924_v28, %v920_v26  ;;  %v2215_v38 = vpack.c.bf16 %v933_v31, %v929_v30  ;;  %v1355_v28 = vld [vmem:[%s3153_s11 + $0x48] sm:$0xff]  ;;  %v2264_v30 = vpack.c.bf16 %v1387_v24, %v1386_v22 }
  0xd7   :  { %2194 = vmatpush1.bf16.msra.mxu1 %v2193_v34  ;;  %2100 = vmatprep.subr.bf16.mxu0 %v2099_v35  ;;  %v2119_v34 = vpack.c.bf16 %v931_v20, %v927_v29  ;;  %v926_v35 = vld [vmem:[#allocation5 + $0x5c0] sm:$0xff]  ;;  %v1372_v29 = vld [vmem:[%s3153_s11 + $0xd0] sm:$0xff]  ;;  %v1373_v20 = vld [vmem:[%s3153_s11 + $0xd8] sm:$0xff] }
  0xd8   :  { %2196 = vmatprep.subr.bf16.mxu1 %v2195_v40  ;;  %v932_v40 = vld [vmem:[#allocation5 + $0x5f0] sm:$0xff]  ;;  %v2121_v42 = vpack.c.bf16 %v930_v37, %v926_v35  ;;  %v1357_v37 = vld [vmem:[%s3153_s11 + $0x58] sm:$0xff] }
  0xd9   :  { %v2217_v43 = vpack.c.bf16 %v932_v40, %v928_v39  ;;  %v1356_v35 = vld [vmem:[%s3153_s11 + $0x50] sm:$0xff]  ;;  %v1390_v40 = vld [vmem:[%s3153_s11 + $0x160] sm:$0xff] }
  0xda   :  { %2102 = vmatpush1.bf16.msra.mxu0 %v2101_v41  ;;  %v1378_v41 = vld [vmem:[%s3153_s11 + $0x100] sm:$0xff]  ;;  %v2241_v39 = vpack.c.bf16 %v1357_v37, %v1356_v35 }
  0xdb   :  { %2198 = vmatpush1.bf16.msra.mxu1 %v2197_v47  ;;  %2104 = vmatprep.subr.bf16.mxu0 %v2103_v48  ;;  %v1379_v47 = vld [vmem:[%s3153_s11 + $0x108] sm:$0xff]  ;;  %v1362_v48 = vld [vmem:[%s3153_s11 + $0x80] sm:$0xff] }
  0xdc   :  { %2200 = vmatprep.subr.bf16.mxu1 %v2199_v52  ;;  %v936_v52 = vld [vmem:[#allocation5 + $0x610] sm:$0xff]  ;;  %v2252_v53 = vpack.c.bf16 %v1379_v47, %v1378_v41  ;;  %v2219_v54 = vpack.c.bf16 %v1363_v49, %v1362_v48  ;;  %v1358_v41 = vld [vmem:[%s3153_s11 + $0x60] sm:$0xff]  ;;  %v1359_v47 = vld [vmem:[%s3153_s11 + $0x68] sm:$0xff] }
  0xdd   :  { %v2245_v48 = vpack.c.bf16 %v1359_v47, %v1358_v41  ;;  %v1392_v49 = vld [vmem:[%s3153_s11 + $0x170] sm:$0xff]  ;;  %v938_v41 = vld [vmem:[%s3147_s5] sm:$0xf] }
  0xde   :  { %2106 = vmatpush1.bf16.msra.mxu0 %v2105_v57  ;;  %v1380_v57 = vld [vmem:[%s3153_s11 + $0x110] sm:$0xff]  ;;  %v2273_v51 = vpack.c.bf16 %v1393_v50, %v1392_v49  ;;  %v1267_v47 = vld [vmem:[%s3149_s7] sm:$0xf] }
  0xdf   :  { %2202 = vmatpush1.bf16.msra.mxu1 %v2201_v58  ;;  %2108 = vmatprep.subr.bf16.mxu0 %v2107_v59  ;;  %v1381_v58 = vld [vmem:[%s3153_s11 + $0x118] sm:$0xff]  ;;  %v2223_v59 = vpack.c.bf16 %v1365_v55, %v1364_v25  ;;  %v1293_v49 = vld [vmem:[%s3151_s9] sm:$0xf] }
  0xe0   :  { %2204 = vmatprep.subr.bf16.mxu1 %v2203_v0  ;;  %v1366_v0 = vld [vmem:[%s3153_s11 + $0xa0] sm:$0xff]  ;;  %v2255_v2 = vpack.c.bf16 %v1381_v58, %v1380_v57  ;;  %v1377_v25 = vld [vmem:[%s3153_s11 + $0xf8] sm:$0xff]  ;;  %v709_v58 = vld [vmem:[%s3152_s10 + $0x88] sm:$0xff] }
  0xe1   :  { %v2227_v5 = vpack.c.bf16 %v1367_v1, %v1366_v0  ;;  %v1361_v55 = vld [vmem:[%s3153_s11 + $0x78] sm:$0xff]  ;;  %v708_v57 = vld [vmem:[%s3152_s10 + $0x80] sm:$0xff]  ;;  %v2843_v0 = vsub.s32 0, %v2626_v61 }
  0xe2   :  { %2110 = vmatpush1.bf16.msra.mxu0 %v2109_v6  ;;  %v1350_v6 = vld [vmem:[%s3153_s11 + $0x20] sm:$0xff]  ;;  %v2275_v62 = vpack.c.bf16 %v709_v58, %v708_v57 }
  0xe3   :  { %2206 = vmatpush1.bf16.msra.mxu1 %v2205_v7  ;;  %2112 = vmatprep.subr.bf16.mxu0 %v2111_v8  ;;  %v1351_v7 = vld [vmem:[%s3153_s11 + $0x28] sm:$0xff]  ;;  %v1368_v8 = vld [vmem:[%s3153_s11 + $0xb0] sm:$0xff]  ;;  %v276_v1 = vld [vmem:[%s3146_s4] sm:$0xf]  ;;  %v1298_v57 = vrot.slane %v1293_v49, %v2843_v0 }
  0xe4   :  { %2208 = vmatprep.subr.bf16.mxu1 %v2207_v13  ;;  %v2229_v12 = vpack.c.bf16 %v1351_v7, %v1350_v6  ;;  %v1384_v13 = vld [vmem:[%s3153_s11 + $0x130] sm:$0xff]  ;;  %v2231_v15 = vpack.c.bf16 %v1369_v9, %v1368_v8  ;;  %v632_v6 = vld [vmem:[%s3150_s8] sm:$0xf] }
  0xe6   :  { %2114 = vmatpush1.bf16.msra.mxu0 %v2113_v19  ;;  %v1371_v19 = vld [vmem:[%s3153_s11 + $0xc8] sm:$0xff] }
  0xe7   :  { %2210 = vmatpush1.bf16.msra.mxu1 %v2209_v21  ;;  %2116 = vmatprep.subr.bf16.mxu0 %v2115_v23  ;;  %v2261_v21 = vpack.c.bf16 %v1385_v14, %v1384_v13  ;;  %v2233_v23 = vpack.c.bf16 %v1353_v17, %v1352_v16  ;;  %v2235_v26 = vpack.c.bf16 %v1371_v19, %v1370_v18 }
  0xe8   :  { %2212 = vmatprep.subr.bf16.mxu1 %v2211_v27  ;;  %v1354_v27 = vld [vmem:[%s3153_s11 + $0x40] sm:$0xff] }
  0xe9   :  { %v2237_v31 = vpack.c.bf16 %v1355_v28, %v1354_v27 }
  0xea   :  { %2118 = vmatpush1.bf16.msra.mxu0 %v2117_v32  ;;  %v1388_v32 = vld [vmem:[%s3153_s11 + $0x150] sm:$0xff] }
  0xeb   :  { %2214 = vmatpush1.bf16.msra.mxu1 %v2213_v33  ;;  %2120 = vmatprep.subr.bf16.mxu0 %v2119_v34  ;;  %v1389_v33 = vld [vmem:[%s3153_s11 + $0x158] sm:$0xff]  ;;  %v2239_v34 = vpack.c.bf16 %v1373_v20, %v1372_v29 }
  0xec   :  { %2216 = vmatprep.subr.bf16.mxu1 %v2215_v38  ;;  %v2267_v38 = vpack.c.bf16 %v1389_v33, %v1388_v32 }
  0xee   :  { %2122 = vmatpush1.bf16.msra.mxu0 %v2121_v42  ;;  %v1391_v42 = vld [vmem:[%s3153_s11 + $0x168] sm:$0xff] }
  0xef   :  { %2218 = vmatpush1.bf16.msra.mxu1 %v2217_v43  ;;  %1086 = vmatprep.subr.mxu0 %v935_v44  ;;  %v2270_v43 = vpack.c.bf16 %v1391_v42, %v1390_v40  ;;  %v1374_v44 = vld [vmem:[%s3153_s11 + $0xe0] sm:$0xff] }
  0xf0   :  { %1228 = vmatprep.subr.mxu1 %v937_v45  ;;  %v1375_v45 = vld [vmem:[%s3153_s11 + $0xe8] sm:$0xff] }
  0xf2   :  { %1087 = vmatpush1.msra.mxu0 %v934_v46  ;;  %v2243_v46 = vpack.c.bf16 %v1375_v45, %v1374_v44 }
  0xf3   :  { %1229 = vmatpush1.msra.mxu1 %v936_v52  ;;  %1119 = vmatmul.mubr.f32.vlgmr.msra.gmra.mrb[2].mxu0 %v2669_v36  ;;  %v1376_v52 = vld [vmem:[%s3153_s11 + $0xf0] sm:$0xff] }
  0xf4   :  { %1261 = vmatmul.mubr.f32.vlgmr.msra.gmra.mrb[2].mxu1 %v2669_v36  ;;  %2251 = vmatprep.subr.bf16.mxu1 %v2511_v63  ;;  %v1382_v36 = vld [vmem:[%s3153_s11 + $0x120] sm:$0xff] }
  0xf5   :  { %2253 = vmatpush1.bf16.msra.mxu1 %v2252_v53  ;;  %2220 = vmatprep.subr.bf16.mxu0 %v2219_v54  ;;  %v2258_v10 = vpack.c.bf16 %v1383_v4, %v1382_v36  ;;  %v2247_v53 = vpack.c.bf16 %v1377_v25, %v1376_v52  ;;  %v1360_v54 = vld [vmem:[%s3153_s11 + $0x70] sm:$0xff]  ;;  %v2855_v36 = vsub.s32 3, %v2626_v61  ;;  %v606_v4 = vld [vmem:[%s3148_s6] sm:$0xf]  ;;  %v1272_v52 = vrot.slane %v1267_v47, %v2843_v0  ;;  %s2513_s6 = smov [#allocation8]  }
  0xf6   :  { %2222 = vmatpush3.bf16.msra.mxu0 %v2221_v56  ;;  %2254 = vmatprep.subr.bf16.mxu1 %v2511_v63  ;;  %v2249_v56 = vpack.c.bf16 %v1361_v55, %v1360_v54  ;;  %v611_v9 = vrot.slane %v606_v4, %v2843_v0  ;;  %s1717_s8 = sshll.u32 %s2513_s6, 4  ;;  %s1718_s8 = int_to_ptr.vmem [resolvable:$true] %s1717_s8 }
  0xf7   :  { %2224 = vmatprep.subr.bf16.mxu0 %v2223_v59  ;;  %v2512_v59 = vmov 0.0   ;;  %v623_v18 = vrot.slane %v606_v4, %v2855_v36  ;;  %v649_v28 = vrot.slane %v632_v6, %v2855_v36  ;;  %v955_v25 = vrot.slane %v938_v41, %v2855_v36  ;;  %s2408_s1 = scalar_lea.vmem %s1718_s8, 128  ;;  %p2413_p3 = scmp.lt.s32.totalorder %s1718_s8, %s1718_s8 }
  0xf8   :  { %p2409_p2 = scmp.ne.s32.totalorder %s1718_s8, %s2408_s1  ;;  %p2414_p4 = scmp.lt.s32.totalorder %s2408_s1, %s2408_s1 }
  0xf9   :  { %2256 = vmatpush1.bf16.msra.mxu1 %v2255_v2  ;;  %v2849_v2 = vsub.s32 2, %v2626_v61 }
  0xfa   :  { %2226 = vmatpush3.bf16.msra.mxu0 %v2225_v3  ;;  %2257 = vmatprep.subr.bf16.mxu1 %v2511_v63  ;;  %v2852_v3 = vsub.s32 1, %v2626_v61  ;;  %p2415_p5 = por %p2414_p4, %p2413_p3 }
  0xfb   :  { %2228 = vmatprep.subr.bf16.mxu0 %v2227_v5  ;;  %v281_v5 = vrot.slane %v276_v1, %v2843_v0  ;;  %v289_v7 = vrot.slane %v276_v1, %v2849_v2  ;;  %v951_v50 = vrot.slane %v938_v41, %v2849_v2  ;;  %v1280_v54 = vrot.slane %v1267_v47, %v2849_v2 }
  0xfc   :  { %v285_v8 = vrot.slane %v276_v1, %v2852_v3  ;;  %v615_v13 = vrot.slane %v606_v4, %v2852_v3  ;;  %v641_v24 = vrot.slane %v632_v6, %v2852_v3  ;;  %v1276_v55 = vrot.slane %v1267_v47, %v2852_v3  ;;  %p2416_p6 = pnand %p2415_p5, %p2409_p2 }
  0xfd   :  { %2259 = vmatpush1.bf16.msra.mxu1 %v2258_v10  ;;  %v293_v10 = vrot.slane %v276_v1, %v2855_v36 }
  0xfe   :  { %2230 = vmatpush3.bf16.msra.mxu0 %v2229_v12  ;;  %2260 = vmatprep.subr.bf16.mxu1 %v2511_v63  ;;  %v619_v12 = vrot.slane %v606_v4, %v2849_v2  ;;  %v1306_v4 = vrot.slane %v1293_v49, %v2849_v2 }
  0xff   :  { %2232 = vmatprep.subr.bf16.mxu0 %v2231_v15  ;;  %v637_v15 = vrot.slane %v632_v6, %v2843_v0 }
 0x101   :  { %2262 = vmatpush1.bf16.msra.mxu1 %v2261_v21  ;;  %v645_v21 = vrot.slane %v632_v6, %v2849_v2  ;;  %v693_v2 = vld [vmem:[%s3152_s10 + $0x8] sm:$0xff] }
 0x102   :  { %2234 = vmatpush3.bf16.msra.mxu0 %v2233_v23  ;;  %2263 = vmatprep.subr.bf16.mxu1 %v2511_v63 }
 0x103   :  { %2236 = vmatprep.subr.bf16.mxu0 %v2235_v26 }
 0x105   :  { %2265 = vmatpush1.bf16.msra.mxu1 %v2264_v30 }
 0x106   :  { %2238 = vmatpush3.bf16.msra.mxu0 %v2237_v31  ;;  %2266 = vmatprep.subr.bf16.mxu1 %v2511_v63 }
 0x107   :  { %2240 = vmatprep.subr.bf16.mxu0 %v2239_v34 }
 0x109   :  { %2268 = vmatpush1.bf16.msra.mxu1 %v2267_v38 }
 0x10a   :  { %2242 = vmatpush3.bf16.msra.mxu0 %v2241_v39  ;;  %2269 = vmatprep.subr.bf16.mxu1 %v2511_v63 }
 0x10b   :  { %2244 = vmatprep.subr.bf16.mxu0 %v2243_v46 }
 0x10d   :  { %2271 = vmatpush1.bf16.msra.mxu1 %v2270_v43 }
 0x10e   :  { %2272 = vmatprep.subr.bf16.mxu1 %v2511_v63  ;;  %2246 = vmatpush3.bf16.msra.mxu0 %v2245_v48  ;;  %v943_v48 = vrot.slane %v938_v41, %v2843_v0  ;;  %v692_v0 = vld [vmem:[%s3152_s10] sm:$0xff] }
 0x10f   :  { %2248 = vmatprep.subr.bf16.mxu0 %v2247_v53 }
 0x111   :  { %2274 = vmatpush1.bf16.msra.mxu1 %v2273_v51  ;;  %v947_v51 = vrot.slane %v938_v41, %v2852_v3 }
 0x112   :  { %2250 = vmatpush3.bf16.msra.mxu0 %v2249_v56  ;;  %1499 = vmatprep.subr.mxu1 %v2512_v59 }
 0x113   :  { %2276 = vmatprep.subr.bf16.mxu0 %v2275_v62  ;;  %v1284_v62 = vrot.slane %v1267_v47, %v2855_v36 }
 0x115   :  { %1500 = vmatpush1.msra.mxu1 %v1394_v60 }
 0x116   :  { %2307 = vmatprep.subr.bf16.mxu1 %v2511_v63 }
 0x163   :  { %v459_v61 = vpop.f32.mrb[0].mxu0 }
 0x164   :  { %v2331_v14 = vadd.f32 %v459_v61, %v281_v5  ;;  %v601_v16 = vpop.f32.mrb[0].mxu1  ;;  %v461_v17 = vpop.f32.mrb[1].mxu0 }
 0x165   :  { %v2333_v19 = vadd.f32 %v601_v16, %v289_v7  ;;  %v2332_v23 = vadd.f32 %v461_v17, %v285_v8  ;;  %v603_v22 = vpop.f32.mrb[1].mxu1  ;;  %v1302_v7 = vrot.slane %v1293_v49, %v2852_v3  ;;  %v724_v3 = vld [vmem:[%s3152_s10 + $0x100] sm:$0xff] }
 0x166   :  { %v628_v26 = vmul.f32 %v2331_v14, %v611_v9  ;;  %v2334_v27 = vadd.f32 %v603_v22, %v293_v10  ;;  %v1310_v10 = vrot.slane %v1293_v49, %v2855_v36  ;;  %v725_v36 = vld [vmem:[%s3152_s10 + $0x108] sm:$0xff] }
 0x167   :  { %v630_v29 = vmul.f32 %v2333_v19, %v619_v12  ;;  %v629_v20 = vmul.f32 %v2332_v23, %v615_v13  ;;  %v710_v19 = vld [vmem:[%s3152_s10 + $0x90] sm:$0xff] }
 0x168   :  { %v2875_v30 = vadd.f32 %v637_v15, %v628_v26  ;;  %v631_v31 = vmul.f32 %v2334_v27, %v623_v18  ;;  %v2308_v27 = vpack.c.bf16 %v725_v36, %v724_v3  ;;  %v721_v3 = vld [vmem:[%s3152_s10 + $0xe8] sm:$0xff] }
 0x169   :  { %v2877_v32 = vadd.f32 %v645_v21, %v630_v29  ;;  %v2879_v33 = vadd.f32 %v641_v24, %v629_v20  ;;  %v711_v21 = vld [vmem:[%s3152_s10 + $0x98] sm:$0xff]  ;;  %v2277_v24 = vpack.c.bf16 %v693_v2, %v692_v0  ;;  %v726_v20 = vld [vmem:[%s3152_s10 + $0x110] sm:$0xff] }
 0x16a   :  { %v658_v34 = vmax.f32 %v2875_v30, 0.0  ;;  %v2882_v35 = vadd.f32 %v649_v28, %v631_v31  ;;  %v694_v28 = vld [vmem:[%s3152_s10 + $0x10] sm:$0xff]  ;;  %v695_v29 = vld [vmem:[%s3152_s10 + $0x18] sm:$0xff]  ;;  %v1764_v30 = vld [vmem:[%s3154_s12] ss:$0 sm:$0xff]  ;;  %s1707_s12 = sshll.u32 %s2514_s19, 4  ;;  %s1708_s12 = int_to_ptr.vmem [resolvable:$true] %s1707_s12 }
 0x16b   :  { %v660_v37 = vmax.f32 %v2877_v32, 0.0  ;;  %v659_v38 = vmax.f32 %v2879_v33, 0.0  ;;  %v2281_v47 = vpack.c.bf16 %v695_v29, %v694_v28  ;;  %v729_v33 = vld [vmem:[%s3152_s10 + $0x128] sm:$0xff]  ;;  %v703_v0 = vld [vmem:[%s3152_s10 + $0x58] sm:$0xff]  ;;  %v734_v2 = vld [vmem:[%s3152_s10 + $0x150] sm:$0xff] }
 0x16c   :  { %v661_v39 = vmax.f32 %v2882_v35, 0.0 }
 0x16d   :  { %v666_v40 = vcombine.low %v658_v34, %v659_v38 }
 0x16e   :  { %v667_v42 = vcombine.low %v660_v37, %v661_v39 }
 0x16f   :  { %v674_v43 = vrot.slane %v666_v40, %v2629_v11  ;;  %v2279_v40 = vpack.c.bf16 %v711_v21, %v710_v19  ;;  %v704_v19 = vld [vmem:[%s3152_s10 + $0x60] sm:$0xff]  ;;  %v705_v21 = vld [vmem:[%s3152_s10 + $0x68] sm:$0xff] }
 0x170   :  { %v681_v44 = vrot.slane %v667_v42, %v2629_v11  ;;  %v727_v42 = vld [vmem:[%s3152_s10 + $0x118] sm:$0xff] }
 0x172   :  { %v682_v46 = vcombine.low %v674_v43, %v681_v44  ;;  %v712_v43 = vld [vmem:[%s3152_s10 + $0xa0] sm:$0xff]  ;;  %v713_v44 = vld [vmem:[%s3152_s10 + $0xa8] sm:$0xff] }
 0x173   :  { %v2283_v49 = vpack.c.bf16 %v713_v44, %v712_v43 }
 0x174   :  { %691 = vst.msk [vmem:[#allocation7] sm:$0xff] %vm2897_vm7, %v682_v46 }
 0x1c6   :  { %v1120_v53 = vpop.f32.mrb[2].mxu0 }
 0x1c7   :  { %v2335_v56 = vadd.f32 %v1120_v53, %v943_v48  ;;  %v1262_v58 = vpop.f32.mrb[2].mxu1  ;;  %v1122_v60 = vpop.f32.mrb[3].mxu0  ;;  %v2311_v48 = vpack.c.bf16 %v727_v42, %v726_v20  ;;  %v715_v53 = vld [vmem:[%s3152_s10 + $0xb8] sm:$0xff]  ;;  %v706_v20 = vld [vmem:[%s3152_s10 + $0x70] sm:$0xff] }
 0x1c8   :  { %v2337_v1 = vadd.f32 %v1262_v58, %v951_v50  ;;  %v2336_v5 = vadd.f32 %v1122_v60, %v947_v51  ;;  %v1264_v6 = vpop.f32.mrb[3].mxu1  ;;  %v696_v50 = vld [vmem:[%s3152_s10 + $0x20] sm:$0xff]  ;;  %v697_v51 = vld [vmem:[%s3152_s10 + $0x28] sm:$0xff]  ;;  %v731_v58 = vld [vmem:[%s3152_s10 + $0x138] sm:$0xff] }
 0x1c9   :  { %v1289_v8 = vmul.f32 %v2335_v56, %v1272_v52  ;;  %v2338_v9 = vadd.f32 %v1264_v6, %v955_v25  ;;  %v728_v52 = vld [vmem:[%s3152_s10 + $0x120] sm:$0xff]  ;;  %v2285_v35 = vpack.c.bf16 %v697_v51, %v696_v50  ;;  %v699_v56 = vld [vmem:[%s3152_s10 + $0x38] sm:$0xff]  ;;  %v701_v6 = vld [vmem:[%s3152_s10 + $0x48] sm:$0xff] }
 0x1ca   :  { %v1291_v61 = vmul.f32 %v2337_v1, %v1280_v54  ;;  %v1290_v12 = vmul.f32 %v2336_v5, %v1276_v55  ;;  %v698_v55 = vld [vmem:[%s3152_s10 + $0x30] sm:$0xff]  ;;  %v716_v60 = vld [vmem:[%s3152_s10 + $0xc0] sm:$0xff]  ;;  %v739_v42 = vld [vmem:[%s3152_s10 + $0x178] sm:$0xff] }
 0x1cb   :  { %v1315_v13 = vadd.f32 %v1298_v57, %v1289_v8  ;;  %v1292_v14 = vmul.f32 %v2338_v9, %v1284_v62  ;;  %v730_v57 = vld [vmem:[%s3152_s10 + $0x130] sm:$0xff]  ;;  %v717_v62 = vld [vmem:[%s3152_s10 + $0xc8] sm:$0xff]  ;;  %v2289_v1 = vpack.c.bf16 %v699_v56, %v698_v55  ;;  %v700_v5 = vld [vmem:[%s3152_s10 + $0x40] sm:$0xff] }
 0x1cc   :  { %v1317_v15 = vadd.f32 %v1306_v4, %v1291_v61  ;;  %v1316_v16 = vadd.f32 %v1302_v7, %v1290_v12  ;;  %v2317_v45 = vpack.c.bf16 %v731_v58, %v730_v57  ;;  %v2291_v4 = vpack.c.bf16 %v717_v62, %v716_v60  ;;  %v732_v7 = vld [vmem:[%s3152_s10 + $0x140] sm:$0xff]  ;;  %v733_v8 = vld [vmem:[%s3152_s10 + $0x148] sm:$0xff]  ;;  %v718_v9 = vld [vmem:[%s3152_s10 + $0xd0] sm:$0xff] }
 0x1cd   :  { %v1319_v17 = vmax.f32 %v1315_v13, 0.0  ;;  %v1318_v18 = vadd.f32 %v1310_v10, %v1292_v14  ;;  %v719_v10 = vld [vmem:[%s3152_s10 + $0xd8] sm:$0xff]  ;;  %v2293_v61 = vpack.c.bf16 %v701_v6, %v700_v5  ;;  %v2320_v12 = vpack.c.bf16 %v733_v8, %v732_v7  ;;  %v702_v14 = vld [vmem:[%s3152_s10 + $0x50] sm:$0xff] }
 0x1ce   :  { %v1321_v23 = vmax.f32 %v1317_v15, 0.0  ;;  %v1320_v22 = vmax.f32 %v1316_v16, 0.0  ;;  %v2295_v13 = vpack.c.bf16 %v719_v10, %v718_v9  ;;  %v735_v15 = vld [vmem:[%s3152_s10 + $0x158] sm:$0xff]  ;;  %v720_v16 = vld [vmem:[%s3152_s10 + $0xe0] sm:$0xff]  ;;  %v2297_v36 = vpack.c.bf16 %v703_v0, %v702_v14 }
 0x1cf   :  { %v1322_v26 = vmax.f32 %v1318_v18, 0.0  ;;  %v2299_v18 = vpack.c.bf16 %v721_v3, %v720_v16 }
 0x1d0   :  { %v1327_v31 = vcombine.low %v1319_v17, %v1320_v22  ;;  %1461 = vmatprep.mubr.f32.mxu0 %v1320_v22  ;;  %v737_v22 = vld [vmem:[%s3152_s10 + $0x168] sm:$0xff] }
 0x1d1   :  { %v1328_v46 = vcombine.low %v1321_v23, %v1322_v26  ;;  %1762 = vmatprep.mubr.msk.f32.mxu1 %vm319_vm0, %v1322_v26  ;;  %1462 = vmatmul.mubr.f32.vlgmr.msra.gmra.mrb[4].mxu0 %v1319_v17  ;;  %v2323_v17 = vpack.c.bf16 %v735_v15, %v734_v2  ;;  %v723_v26 = vld [vmem:[%s3152_s10 + $0xf8] sm:$0xff] }
 0x1d2   :  { %v1335_v41 = vrot.slane %v1327_v31, %v2629_v11  ;;  %1532 = vmatmul.mubr.f32.vlgmr.msra.gmra.mrb[4].mxu1 %v1321_v23  ;;  %2278 = vmatpush3.bf16.msra.mxu0 %v2277_v24  ;;  %v736_v23 = vld [vmem:[%s3152_s10 + $0x160] sm:$0xff]  ;;  %v722_v24 = vld [vmem:[%s3152_s10 + $0xf0] sm:$0xff]  ;;  %v707_v31 = vld [vmem:[%s3152_s10 + $0x78] sm:$0xff] }
 0x1d3   :  { %2309 = vmatpush1.bf16.msra.mxu1 %v2308_v27  ;;  %1603 = vmatprep.mubr.f32.mxu0 %v659_v38  ;;  %v1342_v25 = vrot.slane %v1328_v46, %v2629_v11  ;;  %v714_v38 = vld [vmem:[%s3152_s10 + $0xb0] sm:$0xff]  ;;  %v2301_v27 = vpack.c.bf16 %v705_v21, %v704_v19  ;;  %v2326_v28 = vpack.c.bf16 %v737_v22, %v736_v23  ;;  %v740_v46 = vld [vmem:[%s3152_s10 + $0x180] sm:$0xff] }
 0x1d4   :  { %1763 = vmatprep.mubr.msk.f32.mxu1 %vm319_vm0, %v661_v39  ;;  %2280 = vmatprep.subr.bf16.mxu0 %v2279_v40  ;;  %v2314_v39 = vpack.c.bf16 %v729_v33, %v728_v52  ;;  %v2287_v54 = vpack.c.bf16 %v715_v53, %v714_v38  ;;  %v2303_v29 = vpack.c.bf16 %v723_v26, %v722_v24  ;;  %v738_v40 = vld [vmem:[%s3152_s10 + $0x170] sm:$0xff] }
 0x1d5   :  { %2310 = vmatprep.subr.bf16.mxu1 %v2511_v63  ;;  %v1343_v11 = vcombine.low %v1335_v41, %v1342_v25  ;;  %v2305_v43 = vpack.c.bf16 %v707_v31, %v706_v20  ;;  %v2329_v44 = vpack.c.bf16 %v739_v42, %v738_v40 }
 0x1d6   :  { %2282 = vmatpush3.bf16.msra.mxu0 %v2281_v47 }
 0x1d7   :  { %2312 = vmatpush1.bf16.msra.mxu1 %v2311_v48  ;;  %2284 = vmatprep.subr.bf16.mxu0 %v2283_v49  ;;  %1345 = vst.msk [vmem:[#allocation8] sm:$0xff] %vm2897_vm7, %v1343_v11 }
 0x1d8   :  { %2313 = vmatprep.subr.bf16.mxu1 %v2511_v63 }
 0x1da   :  { %2286 = vmatpush3.bf16.msra.mxu0 %v2285_v35 }
 0x1db   :  { %2315 = vmatpush1.bf16.msra.mxu1 %v2314_v39  ;;  %2288 = vmatprep.subr.bf16.mxu0 %v2287_v54 }
 0x1dc   :  { %2316 = vmatprep.subr.bf16.mxu1 %v2511_v63 }
 0x1de   :  { %2290 = vmatpush3.bf16.msra.mxu0 %v2289_v1 }
 0x1df   :  { %2318 = vmatpush1.bf16.msra.mxu1 %v2317_v45  ;;  %2292 = vmatprep.subr.bf16.mxu0 %v2291_v4 }
 0x1e0   :  { %2319 = vmatprep.subr.bf16.mxu1 %v2511_v63 }
 0x1e2   :  { %2294 = vmatpush3.bf16.msra.mxu0 %v2293_v61 }
 0x1e3   :  { %2321 = vmatpush1.bf16.msra.mxu1 %v2320_v12  ;;  %2296 = vmatprep.subr.bf16.mxu0 %v2295_v13 }
 0x1e4   :  { %2322 = vmatprep.subr.bf16.mxu1 %v2511_v63 }
 0x1e6   :  { %2298 = vmatpush3.bf16.msra.mxu0 %v2297_v36 }
 0x1e7   :  { %2324 = vmatpush1.bf16.msra.mxu1 %v2323_v17  ;;  %2300 = vmatprep.subr.bf16.mxu0 %v2299_v18 }
 0x1e8   :  { %2325 = vmatprep.subr.bf16.mxu1 %v2511_v63 }
 0x1ea   :  { %2302 = vmatpush3.bf16.msra.mxu0 %v2301_v27 }
 0x1eb   :  { %2327 = vmatpush1.bf16.msra.mxu1 %v2326_v28  ;;  %2304 = vmatprep.subr.bf16.mxu0 %v2303_v29 }
 0x1ec   :  { %2328 = vmatprep.subr.bf16.mxu1 %v2511_v63 }
 0x1ee   :  { %2306 = vmatpush3.bf16.msra.mxu0 %v2305_v43 }
 0x1ef   :  { %2330 = vmatpush1.bf16.msra.mxu1 %v2329_v44 }
 0x1f0   :  { %1641 = vmatprep.subr.mxu1 %v2512_v59 }
 0x1f1   :  { %1604 = vmatmul.mubr.f32.vlgmr.msra.gmra.mrb[6].mxu0 %v658_v34 }
 0x1f3   :  { %1642 = vmatpush1.msra.mxu1 %v740_v46 }
 0x1f4   :  { %1674 = vmatmul.mubr.f32.vlgmr.msra.gmra.mrb[6].mxu1 %v660_v37 }
 0x2a4   :  { %v1797_v41 = vpop.f32.mrb[4].mxu0 }
 0x2a5   :  { %v1533_v47 = vpop.f32.mrb[4].mxu1  ;;  %v1798_v48 = vpop.f32.mrb[5].mxu0 }
 0x2a6   :  { %v1799_v49 = vadd.f32 %v1798_v48, %v1797_v41  ;;  %v1535_v63 = vpop.f32.mrb[5].mxu1 }
 0x2a8   :  { %v1534_v50 = vadd.f32 %v1799_v49, %v1533_v47 }
 0x2c4   :  { %v1832_v51 = vpop.f32.mrb[6].mxu0 }
 0x2c5   :  { %v1833_v52 = vpop.f32.mrb[7].mxu0 }
 0x2c6   :  { %v1834_v59 = vadd.f32 %v1833_v52, %v1832_v51 }
 0x2c7   :  { %v1675_v25 = vpop.f32.mrb[6].mxu1 }
 0x2c8   :  { %v1606_v33 = vadd.f32 %v1834_v59, %v1534_v50  ;;  %v1677_v38 = vpop.f32.mrb[7].mxu1 }
 0x2ca   :  { %v1676_v34 = vadd.f32 %v1675_v25, %v1606_v33 }
 0x2cc   :  { %v1686_v32 = vadd.f32 %v1764_v30, %v1676_v34 }
 0x2ce   :  { %v1689_v37 = vsel %vm1687_vm8, %v1686_v32, -inf  ;;  %1688 = vst.msk [vmem:[#allocation10] sm:$0x3] %vm1687_vm8, %v1686_v32 }
 0x2cf   :  { %1690 = vmax.xlane.f32.xlu0 %v1689_v37 }
 0x35c   :  { %v1691_v53 = vpop.xlane.xlu0 %1690 }
 0x35d   :  { %v1692_v11 = vsub.f32 %v1686_v32, %v1691_v53 }
 0x35f   :  { %v1693_v35 = vmul.f32 1.442695, %v1692_v11 }
 0x361   :  { %2360 = vpow2.f32 %v1693_v35 }
 0x36b   :  { %v2361_v39 = vpop.eup %2360 }
 0x36c   :  { %v1695_v54 = vsel %vm1687_vm8, %v2361_v39, 0.0 }
 0x36d   :  { %1696 = vadd.xlane.f32.xlu0 %v1695_v54 }
 0x36e   :  { %2419 = shalt.err (!%p2416_p6)
}
 0x36f   :  { %s2420_s7 = scalar_lea.hbm %s3156_s14, 128 }
 0x370   :  { %p2421_p7 = scmp.ne.s32.totalorder %s3156_s14, %s2420_s7  ;;  %p2424_p8 = scmp.lt.u32.totalorder %s2420_s7, %s3156_s14 }
 0x372   :  { %p2426_p9 = pnand %p2424_p8, %p2421_p7 }
 0x374   :  { %2429 = shalt.err (!%p2426_p9)
}
 0x375   :  { %1720 = dma.vmem_to_hbm [thread:$0]  %s1718_s8, 128, %s3156_s14, [#allocation9]  }
 0x376   :  { %s2430_s27 = scalar_lea.vmem %s1708_s12, 128  ;;  %p2435_p11 = scmp.lt.s32.totalorder %s1708_s12, %s1708_s12 }
 0x377   :  { %p2431_p10 = scmp.ne.s32.totalorder %s1708_s12, %s2430_s27  ;;  %p2436_p12 = scmp.lt.s32.totalorder %s2430_s27, %s2430_s27 }
 0x379   :  { %p2437_p13 = por %p2436_p12, %p2435_p11 }
 0x37b   :  { %p2438_p0 = pnand %p2437_p13, %p2431_p10 }
 0x37d   :  { %2441 = shalt.err (!%p2438_p0)
}
 0x37e   :  { %s2442_s30 = scalar_lea.hbm %s3155_s13, 128 }
 0x37f   :  { %p2443_p1 = scmp.ne.s32.totalorder %s3155_s13, %s2442_s30  ;;  %p2446_p2 = scmp.lt.u32.totalorder %s2442_s30, %s3155_s13 }
 0x381   :  { %p2448_p3 = pnand %p2446_p2, %p2443_p1 }
 0x383   :  { %2451 = shalt.err (!%p2448_p3)
}
 0x384   :  { %1710 = dma.vmem_to_hbm [thread:$0]  %s1708_s12, 128, %s3155_s13, [#allocation4]  }
 0x385   :  { %s2515_s17 = smov [#allocation10]  }
 0x386   :  { %s1727_s18 = sshll.u32 %s2515_s17, 4  ;;  %s1728_s18 = int_to_ptr.vmem [resolvable:$true] %s1727_s18 }
 0x387   :  { %s2452_s10 = scalar_lea.vmem %s1728_s18, 32  ;;  %p2457_p5 = scmp.lt.s32.totalorder %s1728_s18, %s1728_s18 }
 0x388   :  { %p2453_p4 = scmp.ne.s32.totalorder %s1728_s18, %s2452_s10  ;;  %p2458_p6 = scmp.lt.s32.totalorder %s2452_s10, %s2452_s10 }
 0x38a   :  { %p2459_p7 = por %p2458_p6, %p2457_p5 }
 0x38c   :  { %p2460_p8 = pnand %p2459_p7, %p2453_p4 }
 0x38e   :  { %2463 = shalt.err (!%p2460_p8)
}
 0x38f   :  { %s2464_s8 = scalar_lea.hbm %s3157_s15, 32 }
 0x390   :  { %p2465_p9 = scmp.ne.s32.totalorder %s3157_s15, %s2464_s8  ;;  %p2468_p10 = scmp.lt.u32.totalorder %s2464_s8, %s3157_s15 }
 0x392   :  { %p2470_p11 = pnand %p2468_p10, %p2465_p9 }
 0x394   :  { %2473 = shalt.err (!%p2470_p11)
}
 0x395   :  { %1730 = dma.vmem_to_hbm [thread:$0]  %s1728_s18, 32, %s3157_s15, [#allocation9]  }
 0x396   :  { %s2516_s7 = smov [#allocation11]  }
 0x397   :  { %s1737_s9 = sshll.u32 %s2516_s7, 4  ;;  %s1738_s9 = int_to_ptr.vmem [resolvable:$true] %s1737_s9 }
 0x398   :  { %s2474_s21 = scalar_lea.vmem %s1738_s9, 32  ;;  %p2479_p13 = scmp.lt.s32.totalorder %s1738_s9, %s1738_s9 }
 0x399   :  { %p2475_p12 = scmp.ne.s32.totalorder %s1738_s9, %s2474_s21  ;;  %p2480_p0 = scmp.lt.s32.totalorder %s2474_s21, %s2474_s21 }
 0x39b   :  { %p2481_p1 = por %p2480_p0, %p2479_p13 }
 0x39d   :  { %p2482_p2 = pnand %p2481_p1, %p2475_p12 }
 0x3fa   :  { %v1697_v55 = vpop.xlane.xlu0 %1696 }
 0x3fb   :  { %2362 = vrcp.f32 %v1697_v55 }
 0x405   :  { %v2363_v56 = vpop.eup %2362 }
 0x406   :  { %v1699_v57 = vmul.f32 %v2363_v56, %v2361_v39 }
 0x408   :  { %1700 = vst.msk [vmem:[#allocation11] sm:$0x3] %vm1687_vm8, %v1699_v57 }
 0x409   :  { %2485 = shalt.err (!%p2482_p2)
}
 0x40a   :  { %s2486_s15 = scalar_lea.hbm %s3158_s16, 32 }
 0x40b   :  { %p2487_p3 = scmp.ne.s32.totalorder %s3158_s16, %s2486_s15  ;;  %p2490_p4 = scmp.lt.u32.totalorder %s2486_s15, %s3158_s16 }
 0x40d   :  { %p2492_p5 = pnand %p2490_p4, %p2487_p3 }
 0x40f   :  { %2495 = shalt.err (!%p2492_p5)
}
 0x410   :  { %1740 = dma.vmem_to_hbm [thread:$0]  %s1738_s9, 32, %s3158_s16, [#allocation12]  }
 0x411   :  { %2500 = dma.done.wait [#allocation4], 128  }
 0x412   :  { %2501 = vsyncadd [#allocation4], 4294967168 }
 0x413   :  { %2502 = dma.done.wait [#allocation9], 160  }
 0x414   :  { %2503 = vsyncadd [#allocation9], 4294967136 }
 0x415   :  { %2504 = dma.done.wait [#allocation12], 32  }
 0x416   :  { %2505 = vsyncadd [#allocation12], 4294967264 }
 0x417   :  { %1753 = vsyncpa [#allocation3], 1 }
 0x418   :  { %1754 = vsyncpa [#allocation6], 1 }
 0x419   :  { %1755 = vsyncpa [#allocation4], 1 }
 0x41a   :  { %1756 = vsyncpa [#allocation9], 1 }
 0x41b   :  { %1757 = vsyncpa [#allocation12], 1 }

</bundles_post_ra>
